<compile_context>
chip_gen: v6e
topology: v6e:2x2x1
jax: 0.10.0
libtpu: 0.0.40
codegen_flags: <defaults>
</compile_context>

<pallas_src>
import jax
import jax.numpy as jnp
from jax.experimental import pallas as pl
from jax.experimental.pallas import tpu as pltpu

NEG_BIG = -1e30  # finite "-inf" for padded logit lanes (avoids inf-inf NaNs)


def _make_kernel(n_layers, L, H, G, OPAD, offs):
    """G = 4*H gate width; offs = row offsets into the packed weight slab."""

    def kernel(tok_ref, embtab_ref, pk_ref, out_ref):
        # ---- Static carves of the packed weight slab (one DMA for all of it).
        whh0 = pk_ref[pl.ds(offs["whh0"], H), :][:, :G]                 # (H, 4H)
        wcat, bias = [], []
        for l in range(1, n_layers):
            wcat.append(pk_ref[pl.ds(offs["wcat"][l], 2 * H), :][:, :G])  # (2H,4H)
            bias.append(pk_ref[pl.ds(offs["bias"][l], 1), :][:, :G])      # (1, 4H)
        wcls = pk_ref[pl.ds(offs["wcls"], H), :][:, :OPAD]              # (H, OPAD)
        bcls = pk_ref[pl.ds(offs["bcls"], 1), :][:, :OPAD]              # (1, OPAD)

        # ---- Gate-lane constants (the 0.5 PRE-scale is already folded into the
        # weights in the wrapper).  Lanes [2H,3H) are the tanh 'g' gate; all
        # other lanes are sigmoid gates: sigmoid(x) = 0.5*tanh(0.5*x) + 0.5.
        lane = jax.lax.broadcasted_iota(jnp.int32, (1, G), 1)
        is_g = jnp.logical_and(lane >= 2 * H, lane < 3 * H)
        scale = jnp.where(is_g, 1.0, 0.5).astype(jnp.float32)
        shift = jnp.where(is_g, 0.0, 0.5).astype(jnp.float32)

        # ---- Layer-0 input projection: lane-dense gather of the pre-folded
        # (V, 4H) table, held as values (no scratch buffer, no layer-0 matmul).
        xrows = [embtab_ref[pl.ds(tok_ref[t], 1), :][:, :G] for t in range(L)]

        logit_rows = []
        prev_h = None
        for layer in range(n_layers):
            h = jnp.zeros((1, H), jnp.float32)   # h_0 / c_0 = zeros (h_0=None)
            c = jnp.zeros((1, H), jnp.float32)
            cur_h = []
            for t in range(L):
                if layer == 0:
                    gates = xrows[t] + jnp.dot(
                        h, whh0, preferred_element_type=jnp.float32)    # (1, 4H)
                else:
                    # Per-step fused projection: depends only on h_{l-1,t} and
                    # h_{l,t-1} -> layers can wavefront in the unrolled block.
                    cat = jnp.concatenate([prev_h[t], h], axis=1)       # (1, 2H)
                    gates = jnp.dot(cat, wcat[layer - 1],
                                    preferred_element_type=jnp.float32) \
                        + bias[layer - 1]                               # (1, 4H)
                # One EUP tanh for all four gates (pre-scale folded into weights).
                act = jnp.tanh(gates) * scale + shift
                # PyTorch gate order: i, f, g, o.
                i_g = act[:, 0:H]
                f_g = act[:, H:2 * H]
                g_g = act[:, 2 * H:3 * H]
                o_g = act[:, 3 * H:4 * H]
                c = f_g * c + i_g * g_g
                h = o_g * jnp.tanh(c)
                cur_h.append(h)
                if layer == n_layers - 1:
                    # Incremental classifier: overlaps with recurrence tail.
                    logit_rows.append(
                        jnp.dot(h, wcls, preferred_element_type=jnp.float32)
                        + bcls)                                         # (1, OPAD)
            prev_h = cur_h

            # TODO(synk): inter-layer dropout (training-only in PyTorch) is not
            # applied; this matches eval-mode semantics.

        # ---- log_softmax over lane-dense padded logits (padded lanes = -1e30).
        logits = jnp.concatenate(logit_rows, axis=0)                    # (L, OPAD)
        m = jnp.max(logits, axis=-1, keepdims=True)
        z = logits - m
        lse = jnp.log(jnp.sum(jnp.exp(z), axis=-1, keepdims=True))
        out_ref[...] = z - lse

    return kernel


def recurrent_network_forward(tokens, embedding, lstm_params, w_cls_T, b_cls):
    """tokens: (L,) int32; embedding: (V, E); lstm_params: list of
    (w_ih_T, w_hh_T, bias) per layer (already transposed to (in,4H)/(H,4H) and
    bias = b_ih + b_hh as (1,4H)); w_cls_T: (H, O); b_cls: (1, O)."""
    L = tokens.shape[0]
    V = embedding.shape[0]
    H = lstm_params[0][1].shape[0]
    G = 4 * H
    O = w_cls_T.shape[1]
    n_layers = len(lstm_params)

    OPAD = max(128, ((O + 127) // 128) * 128)
    GPAD = ((G + 127) // 128) * 128
    LANE = max(GPAD, OPAD)

    # Gate-wise pre-scale: fold the 0.5 of sigmoid(x)=0.5*tanh(0.5x)+0.5 into
    # the i/f/o columns of every weight & bias (weight-side constant fold).
    g_lanes = (jnp.arange(G) >= 2 * H) & (jnp.arange(G) < 3 * H)
    gs = jnp.where(g_lanes, 1.0, 0.5).astype(jnp.float32)

    def pad_lane(a, width, fill=0.0):
        out = jnp.full((a.shape[0], width), fill, jnp.float32)
        return out.at[:, :a.shape[1]].set(a.astype(jnp.float32))

    def rup8(n):
        return ((n + 7) // 8) * 8

    def pad_rows(a):
        rows = rup8(a.shape[0])
        out = jnp.zeros((rows, a.shape[1]), jnp.float32)
        return out.at[:a.shape[0], :].set(a)

    # ---- Layer 0: pre-fold  emb @ W_ih0 + b0  into a lane-dense (V, GPAD) table.
    # TODO(synk): at production vocab sizes keep this table in HBM
    # (memory_space=pl.ANY) and DMA-gather the L rows instead (v7x: 64 MiB VMEM).
    w_ih0, w_hh0, b0 = lstm_params[0]
    w_ih0 = w_ih0.astype(jnp.float32) * gs
    w_hh0 = w_hh0.astype(jnp.float32) * gs
    b0 = b0.astype(jnp.float32) * gs
    emb_tab = pad_lane(embedding.astype(jnp.float32) @ w_ih0 + b0, GPAD)

    # ---- Packed weight slab (8-row-aligned segments, LANE columns).
    segs = []
    offs = {"wcat": {}, "bias": {}}

    def add(seg):
        off = sum(s.shape[0] for s in segs)
        segs.append(pad_rows(seg))
        return off

    offs["whh0"] = add(pad_lane(w_hh0, LANE))

    for l in range(1, n_layers):
        w_ih, w_hh, b = lstm_params[l]
        wcat = jnp.concatenate([w_ih.astype(jnp.float32) * gs,
                                w_hh.astype(jnp.float32) * gs], axis=0)  # (2H, G)
        offs["wcat"][l] = add(pad_lane(wcat, LANE))
        offs["bias"][l] = add(pad_lane(b.astype(jnp.float32) * gs, LANE))

    # Classifier: zero weight columns beyond O; bias lanes [O, OPAD) = -1e30 so
    # padded logits vanish in the softmax normalizer; output sliced to O.
    w_cls_pad = pad_lane(w_cls_T, LANE)
    b_cls_pad = jnp.zeros((1, LANE), jnp.float32)
    b_cls_pad = b_cls_pad.at[:, :OPAD].set(NEG_BIG)
    b_cls_pad = b_cls_pad.at[:, :O].set(b_cls.astype(jnp.float32).reshape(-1))
    offs["wcls"] = add(w_cls_pad)
    offs["bcls"] = add(b_cls_pad)

    packed = jnp.concatenate(segs, axis=0)                              # (rows, LANE)

    # Clamp token ids: dynamic-row gather has no runtime bounds check on TPU.
    tokens = jnp.clip(tokens.astype(jnp.int32), 0, V - 1)

    vmem = pl.BlockSpec(memory_space=pltpu.MemorySpace.VMEM)
    smem = pl.BlockSpec(memory_space=pltpu.MemorySpace.SMEM)

    out = pl.pallas_call(
        _make_kernel(n_layers, L, H, G, OPAD, offs),
        out_shape=jax.ShapeDtypeStruct((L, OPAD), jnp.float32),
        in_specs=[smem, vmem, vmem],
        out_specs=vmem,
    )(tokens, emb_tab, packed)

    return out[:, :O]


def reference_forward(tokens, embedding, lstm_params, w_cls_T, b_cls):
    """Pure-JAX reference of the same forward pass."""
    x = jnp.take(embedding, tokens, axis=0).astype(jnp.float32)
    H = lstm_params[0][1].shape[0]
    for (wih_T, whh_T, b) in lstm_params:
        h = jnp.zeros((1, H), jnp.float32)
        c = jnp.zeros((1, H), jnp.float32)
        outs = []
        for t in range(x.shape[0]):
            g = x[t:t + 1] @ wih_T + h @ whh_T + b
            i = jax.nn.sigmoid(g[:, :H])
            f = jax.nn.sigmoid(g[:, H:2 * H])
            gg = jnp.tanh(g[:, 2 * H:3 * H])
            o = jax.nn.sigmoid(g[:, 3 * H:])
            c = f * c + i * gg
            h = o * jnp.tanh(c)
            outs.append(h)
        x = jnp.concatenate(outs, axis=0)
    logits = x @ w_cls_T + b_cls
    return jax.nn.log_softmax(logits, axis=1)


if __name__ == "__main__":
    # Module hyperparameters (small, consistent with the forward pass):
    VOCAB, OUT, EMB, HID, N_LAYERS, PAD_IDX = 50, 10, 16, 32, 2, 0
    SEQ_LEN = 8

    key = jax.random.PRNGKey(0)
    keys = jax.random.split(key, 12)
    k = 1.0 / (HID ** 0.5)

    # Embedding(vocab_size, embedding_dim, padding_idx=pad_idx): N(0,1), pad row zero.
    embedding = jax.random.normal(keys[0], (VOCAB, EMB), jnp.float32)
    embedding = embedding.at[PAD_IDX].set(0.0)

    # LSTM(embedding_dim, hidden_dim, n_layers): U(-1/sqrt(H), 1/sqrt(H)).
    lstm_params = []
    ki = 1
    for layer in range(N_LAYERS):
        in_dim = EMB if layer == 0 else HID
        w_ih = jax.random.uniform(keys[ki], (4 * HID, in_dim), jnp.float32, -k, k); ki += 1
        w_hh = jax.random.uniform(keys[ki], (4 * HID, HID), jnp.float32, -k, k); ki += 1
        b_ih = jax.random.uniform(keys[ki], (4 * HID,), jnp.float32, -k, k); ki += 1
        b_hh = jax.random.uniform(keys[ki], (4 * HID,), jnp.float32, -k, k); ki += 1
        lstm_params.append((w_ih.T, w_hh.T, (b_ih + b_hh).reshape(1, 4 * HID)))

    # Linear(hidden_dim, output_size).
    w_cls = jax.random.uniform(keys[ki], (OUT, HID), jnp.float32, -k, k); ki += 1
    b_cls = jax.random.uniform(keys[ki], (OUT,), jnp.float32, -k, k).reshape(1, OUT); ki += 1

    # nn_input: 1-D sequence of token ids (batch=1, per .view(len(nn_input), 1, -1)).
    tokens = jax.random.randint(keys[ki], (SEQ_LEN,), 0, VOCAB, dtype=jnp.int32)

    out = recurrent_network_forward(tokens, embedding, lstm_params, w_cls.T, b_cls)
    out = jax.block_until_ready(out)

    ref = reference_forward(tokens, embedding, lstm_params, w_cls.T, b_cls)
    assert out.shape == (SEQ_LEN, OUT)
    assert jnp.allclose(out, ref, atol=1e-3, rtol=1e-3), "mismatch vs pure-JAX reference"

    print("KERNEL_OK")
</pallas_src>

<mosaic_0001>
module attributes {stable_mosaic.version = 11 : i64} {
  func.func @kernel(%arg0: memref<8xi32, #tpu.memory_space<smem>>, %arg1: memref<50x128xf32, #tpu.memory_space<vmem>>, %arg2: memref<144x128xf32, #tpu.memory_space<vmem>>, %arg3: memref<8x128xf32, #tpu.memory_space<vmem>>) attributes {dimension_semantics = [], scalar_prefetch = 0 : i64, scratch_operands = 0 : i64, tpu.core_type = #tpu.core_type<tc>} {
    %c0 = arith.constant 0 : index
    %c0_0 = arith.constant 0 : index
    %0 = vector.load %arg2[%c0, %c0_0] : memref<144x128xf32, #tpu.memory_space<vmem>>, vector<32x128xf32>
    %c32 = arith.constant 32 : index
    %c0_1 = arith.constant 0 : index
    %1 = vector.load %arg2[%c32, %c0_1] : memref<144x128xf32, #tpu.memory_space<vmem>>, vector<64x128xf32>
    %c96 = arith.constant 96 : index
    %c0_2 = arith.constant 0 : index
    %2 = vector.load %arg2[%c96, %c0_2] : memref<144x128xf32, #tpu.memory_space<vmem>>, vector<1x128xf32>
    %c104 = arith.constant 104 : index
    %c0_3 = arith.constant 0 : index
    %3 = vector.load %arg2[%c104, %c0_3] : memref<144x128xf32, #tpu.memory_space<vmem>>, vector<32x128xf32>
    %c136 = arith.constant 136 : index
    %c0_4 = arith.constant 0 : index
    %4 = vector.load %arg2[%c136, %c0_4] : memref<144x128xf32, #tpu.memory_space<vmem>>, vector<1x128xf32>
    %5 = tpu.iota {dimensions = array<i32: 1>} : vector<1x128xi32>
    %c64_i32 = arith.constant 64 : i32
    %6 = vector.broadcast %c64_i32 : i32 to vector<1x128xi32>
    %7 = arith.cmpi sge, %5, %6 : vector<1x128xi32>
    %c96_i32 = arith.constant 96 : i32
    %8 = vector.broadcast %c96_i32 : i32 to vector<1x128xi32>
    %9 = arith.cmpi slt, %5, %8 : vector<1x128xi32>
    %10 = arith.andi %7, %9 : vector<1x128xi1>
    %cst = arith.constant 1.000000e+00 : f32
    %cst_5 = arith.constant 5.000000e-01 : f32
    %11 = vector.broadcast %cst : f32 to vector<1x128xf32>
    %12 = vector.broadcast %cst_5 : f32 to vector<1x128xf32>
    %13 = arith.select %10, %11, %12 : vector<1x128xi1>, vector<1x128xf32>
    %cst_6 = arith.constant 0.000000e+00 : f32
    %cst_7 = arith.constant 5.000000e-01 : f32
    %14 = vector.broadcast %cst_6 : f32 to vector<1x128xf32>
    %15 = vector.broadcast %cst_7 : f32 to vector<1x128xf32>
    %16 = arith.select %10, %14, %15 : vector<1x128xi1>, vector<1x128xf32>
    %c0_8 = arith.constant 0 : index
    %17 = memref.load %arg0[%c0_8] : memref<8xi32, #tpu.memory_space<smem>>
    %18 = arith.index_cast %17 : i32 to index
    %c0_9 = arith.constant 0 : index
    %19 = vector.load %arg1[%18, %c0_9] : memref<50x128xf32, #tpu.memory_space<vmem>>, vector<1x128xf32>
    %c1 = arith.constant 1 : index
    %20 = memref.load %arg0[%c1] : memref<8xi32, #tpu.memory_space<smem>>
    %21 = arith.index_cast %20 : i32 to index
    %c0_10 = arith.constant 0 : index
    %22 = vector.load %arg1[%21, %c0_10] : memref<50x128xf32, #tpu.memory_space<vmem>>, vector<1x128xf32>
    %c2 = arith.constant 2 : index
    %23 = memref.load %arg0[%c2] : memref<8xi32, #tpu.memory_space<smem>>
    %24 = arith.index_cast %23 : i32 to index
    %c0_11 = arith.constant 0 : index
    %25 = vector.load %arg1[%24, %c0_11] : memref<50x128xf32, #tpu.memory_space<vmem>>, vector<1x128xf32>
    %c3 = arith.constant 3 : index
    %26 = memref.load %arg0[%c3] : memref<8xi32, #tpu.memory_space<smem>>
    %27 = arith.index_cast %26 : i32 to index
    %c0_12 = arith.constant 0 : index
    %28 = vector.load %arg1[%27, %c0_12] : memref<50x128xf32, #tpu.memory_space<vmem>>, vector<1x128xf32>
    %c4 = arith.constant 4 : index
    %29 = memref.load %arg0[%c4] : memref<8xi32, #tpu.memory_space<smem>>
    %30 = arith.index_cast %29 : i32 to index
    %c0_13 = arith.constant 0 : index
    %31 = vector.load %arg1[%30, %c0_13] : memref<50x128xf32, #tpu.memory_space<vmem>>, vector<1x128xf32>
    %c5 = arith.constant 5 : index
    %32 = memref.load %arg0[%c5] : memref<8xi32, #tpu.memory_space<smem>>
    %33 = arith.index_cast %32 : i32 to index
    %c0_14 = arith.constant 0 : index
    %34 = vector.load %arg1[%33, %c0_14] : memref<50x128xf32, #tpu.memory_space<vmem>>, vector<1x128xf32>
    %c6 = arith.constant 6 : index
    %35 = memref.load %arg0[%c6] : memref<8xi32, #tpu.memory_space<smem>>
    %36 = arith.index_cast %35 : i32 to index
    %c0_15 = arith.constant 0 : index
    %37 = vector.load %arg1[%36, %c0_15] : memref<50x128xf32, #tpu.memory_space<vmem>>, vector<1x128xf32>
    %c7 = arith.constant 7 : index
    %38 = memref.load %arg0[%c7] : memref<8xi32, #tpu.memory_space<smem>>
    %39 = arith.index_cast %38 : i32 to index
    %c0_16 = arith.constant 0 : index
    %40 = vector.load %arg1[%39, %c0_16] : memref<50x128xf32, #tpu.memory_space<vmem>>, vector<1x128xf32>
    %cst_17 = arith.constant 0.000000e+00 : f32
    %41 = vector.broadcast %cst_17 : f32 to vector<1x32xf32>
    %cst_18 = arith.constant 0.000000e+00 : f32
    %42 = vector.broadcast %cst_18 : f32 to vector<1x32xf32>
    %cst_19 = arith.constant dense<0.000000e+00> : vector<1x128xf32>
    %43 = tpu.matmul %41, %0, %cst_19 {dimension_numbers = #tpu.dot_dimension_numbers<[1], [0], [0], [1], [0, 0, 1, 1], [], []>} : vector<1x32xf32>, vector<32x128xf32>, vector<1x128xf32> -> vector<1x128xf32>
    %44 = arith.addf %19, %43 : vector<1x128xf32>
    %45 = math.tanh %44 : vector<1x128xf32>
    %46 = arith.mulf %45, %13 : vector<1x128xf32>
    %47 = arith.addf %46, %16 : vector<1x128xf32>
    %48 = vector.extract_strided_slice %47 {offsets = [0, 0], sizes = [1, 32], strides = [1, 1]} : vector<1x128xf32> to vector<1x32xf32>
    %49 = vector.extract_strided_slice %47 {offsets = [0, 32], sizes = [1, 32], strides = [1, 1]} : vector<1x128xf32> to vector<1x32xf32>
    %50 = vector.extract_strided_slice %47 {offsets = [0, 64], sizes = [1, 32], strides = [1, 1]} : vector<1x128xf32> to vector<1x32xf32>
    %51 = vector.extract_strided_slice %47 {offsets = [0, 96], sizes = [1, 32], strides = [1, 1]} : vector<1x128xf32> to vector<1x32xf32>
    %52 = arith.mulf %49, %42 : vector<1x32xf32>
    %53 = arith.mulf %48, %50 : vector<1x32xf32>
    %54 = arith.addf %52, %53 : vector<1x32xf32>
    %55 = math.tanh %54 : vector<1x32xf32>
    %56 = arith.mulf %51, %55 : vector<1x32xf32>
    %cst_20 = arith.constant dense<0.000000e+00> : vector<1x128xf32>
    %57 = tpu.matmul %56, %0, %cst_20 {dimension_numbers = #tpu.dot_dimension_numbers<[1], [0], [0], [1], [0, 0, 1, 1], [], []>} : vector<1x32xf32>, vector<32x128xf32>, vector<1x128xf32> -> vector<1x128xf32>
    %58 = arith.addf %22, %57 : vector<1x128xf32>
    %59 = math.tanh %58 : vector<1x128xf32>
    %60 = arith.mulf %59, %13 : vector<1x128xf32>
    %61 = arith.addf %60, %16 : vector<1x128xf32>
    %62 = vector.extract_strided_slice %61 {offsets = [0, 0], sizes = [1, 32], strides = [1, 1]} : vector<1x128xf32> to vector<1x32xf32>
    %63 = vector.extract_strided_slice %61 {offsets = [0, 32], sizes = [1, 32], strides = [1, 1]} : vector<1x128xf32> to vector<1x32xf32>
    %64 = vector.extract_strided_slice %61 {offsets = [0, 64], sizes = [1, 32], strides = [1, 1]} : vector<1x128xf32> to vector<1x32xf32>
    %65 = vector.extract_strided_slice %61 {offsets = [0, 96], sizes = [1, 32], strides = [1, 1]} : vector<1x128xf32> to vector<1x32xf32>
    %66 = arith.mulf %63, %54 : vector<1x32xf32>
    %67 = arith.mulf %62, %64 : vector<1x32xf32>
    %68 = arith.addf %66, %67 : vector<1x32xf32>
    %69 = math.tanh %68 : vector<1x32xf32>
    %70 = arith.mulf %65, %69 : vector<1x32xf32>
    %cst_21 = arith.constant dense<0.000000e+00> : vector<1x128xf32>
    %71 = tpu.matmul %70, %0, %cst_21 {dimension_numbers = #tpu.dot_dimension_numbers<[1], [0], [0], [1], [0, 0, 1, 1], [], []>} : vector<1x32xf32>, vector<32x128xf32>, vector<1x128xf32> -> vector<1x128xf32>
    %72 = arith.addf %25, %71 : vector<1x128xf32>
    %73 = math.tanh %72 : vector<1x128xf32>
    %74 = arith.mulf %73, %13 : vector<1x128xf32>
    %75 = arith.addf %74, %16 : vector<1x128xf32>
    %76 = vector.extract_strided_slice %75 {offsets = [0, 0], sizes = [1, 32], strides = [1, 1]} : vector<1x128xf32> to vector<1x32xf32>
    %77 = vector.extract_strided_slice %75 {offsets = [0, 32], sizes = [1, 32], strides = [1, 1]} : vector<1x128xf32> to vector<1x32xf32>
    %78 = vector.extract_strided_slice %75 {offsets = [0, 64], sizes = [1, 32], strides = [1, 1]} : vector<1x128xf32> to vector<1x32xf32>
    %79 = vector.extract_strided_slice %75 {offsets = [0, 96], sizes = [1, 32], strides = [1, 1]} : vector<1x128xf32> to vector<1x32xf32>
    %80 = arith.mulf %77, %68 : vector<1x32xf32>
    %81 = arith.mulf %76, %78 : vector<1x32xf32>
    %82 = arith.addf %80, %81 : vector<1x32xf32>
    %83 = math.tanh %82 : vector<1x32xf32>
    %84 = arith.mulf %79, %83 : vector<1x32xf32>
    %cst_22 = arith.constant dense<0.000000e+00> : vector<1x128xf32>
    %85 = tpu.matmul %84, %0, %cst_22 {dimension_numbers = #tpu.dot_dimension_numbers<[1], [0], [0], [1], [0, 0, 1, 1], [], []>} : vector<1x32xf32>, vector<32x128xf32>, vector<1x128xf32> -> vector<1x128xf32>
    %86 = arith.addf %28, %85 : vector<1x128xf32>
    %87 = math.tanh %86 : vector<1x128xf32>
    %88 = arith.mulf %87, %13 : vector<1x128xf32>
    %89 = arith.addf %88, %16 : vector<1x128xf32>
    %90 = vector.extract_strided_slice %89 {offsets = [0, 0], sizes = [1, 32], strides = [1, 1]} : vector<1x128xf32> to vector<1x32xf32>
    %91 = vector.extract_strided_slice %89 {offsets = [0, 32], sizes = [1, 32], strides = [1, 1]} : vector<1x128xf32> to vector<1x32xf32>
    %92 = vector.extract_strided_slice %89 {offsets = [0, 64], sizes = [1, 32], strides = [1, 1]} : vector<1x128xf32> to vector<1x32xf32>
    %93 = vector.extract_strided_slice %89 {offsets = [0, 96], sizes = [1, 32], strides = [1, 1]} : vector<1x128xf32> to vector<1x32xf32>
    %94 = arith.mulf %91, %82 : vector<1x32xf32>
    %95 = arith.mulf %90, %92 : vector<1x32xf32>
    %96 = arith.addf %94, %95 : vector<1x32xf32>
    %97 = math.tanh %96 : vector<1x32xf32>
    %98 = arith.mulf %93, %97 : vector<1x32xf32>
    %cst_23 = arith.constant dense<0.000000e+00> : vector<1x128xf32>
    %99 = tpu.matmul %98, %0, %cst_23 {dimension_numbers = #tpu.dot_dimension_numbers<[1], [0], [0], [1], [0, 0, 1, 1], [], []>} : vector<1x32xf32>, vector<32x128xf32>, vector<1x128xf32> -> vector<1x128xf32>
    %100 = arith.addf %31, %99 : vector<1x128xf32>
    %101 = math.tanh %100 : vector<1x128xf32>
    %102 = arith.mulf %101, %13 : vector<1x128xf32>
    %103 = arith.addf %102, %16 : vector<1x128xf32>
    %104 = vector.extract_strided_slice %103 {offsets = [0, 0], sizes = [1, 32], strides = [1, 1]} : vector<1x128xf32> to vector<1x32xf32>
    %105 = vector.extract_strided_slice %103 {offsets = [0, 32], sizes = [1, 32], strides = [1, 1]} : vector<1x128xf32> to vector<1x32xf32>
    %106 = vector.extract_strided_slice %103 {offsets = [0, 64], sizes = [1, 32], strides = [1, 1]} : vector<1x128xf32> to vector<1x32xf32>
    %107 = vector.extract_strided_slice %103 {offsets = [0, 96], sizes = [1, 32], strides = [1, 1]} : vector<1x128xf32> to vector<1x32xf32>
    %108 = arith.mulf %105, %96 : vector<1x32xf32>
    %109 = arith.mulf %104, %106 : vector<1x32xf32>
    %110 = arith.addf %108, %109 : vector<1x32xf32>
    %111 = math.tanh %110 : vector<1x32xf32>
    %112 = arith.mulf %107, %111 : vector<1x32xf32>
    %cst_24 = arith.constant dense<0.000000e+00> : vector<1x128xf32>
    %113 = tpu.matmul %112, %0, %cst_24 {dimension_numbers = #tpu.dot_dimension_numbers<[1], [0], [0], [1], [0, 0, 1, 1], [], []>} : vector<1x32xf32>, vector<32x128xf32>, vector<1x128xf32> -> vector<1x128xf32>
    %114 = arith.addf %34, %113 : vector<1x128xf32>
    %115 = math.tanh %114 : vector<1x128xf32>
    %116 = arith.mulf %115, %13 : vector<1x128xf32>
    %117 = arith.addf %116, %16 : vector<1x128xf32>
    %118 = vector.extract_strided_slice %117 {offsets = [0, 0], sizes = [1, 32], strides = [1, 1]} : vector<1x128xf32> to vector<1x32xf32>
    %119 = vector.extract_strided_slice %117 {offsets = [0, 32], sizes = [1, 32], strides = [1, 1]} : vector<1x128xf32> to vector<1x32xf32>
    %120 = vector.extract_strided_slice %117 {offsets = [0, 64], sizes = [1, 32], strides = [1, 1]} : vector<1x128xf32> to vector<1x32xf32>
    %121 = vector.extract_strided_slice %117 {offsets = [0, 96], sizes = [1, 32], strides = [1, 1]} : vector<1x128xf32> to vector<1x32xf32>
    %122 = arith.mulf %119, %110 : vector<1x32xf32>
    %123 = arith.mulf %118, %120 : vector<1x32xf32>
    %124 = arith.addf %122, %123 : vector<1x32xf32>
    %125 = math.tanh %124 : vector<1x32xf32>
    %126 = arith.mulf %121, %125 : vector<1x32xf32>
    %cst_25 = arith.constant dense<0.000000e+00> : vector<1x128xf32>
    %127 = tpu.matmul %126, %0, %cst_25 {dimension_numbers = #tpu.dot_dimension_numbers<[1], [0], [0], [1], [0, 0, 1, 1], [], []>} : vector<1x32xf32>, vector<32x128xf32>, vector<1x128xf32> -> vector<1x128xf32>
    %128 = arith.addf %37, %127 : vector<1x128xf32>
    %129 = math.tanh %128 : vector<1x128xf32>
    %130 = arith.mulf %129, %13 : vector<1x128xf32>
    %131 = arith.addf %130, %16 : vector<1x128xf32>
    %132 = vector.extract_strided_slice %131 {offsets = [0, 0], sizes = [1, 32], strides = [1, 1]} : vector<1x128xf32> to vector<1x32xf32>
    %133 = vector.extract_strided_slice %131 {offsets = [0, 32], sizes = [1, 32], strides = [1, 1]} : vector<1x128xf32> to vector<1x32xf32>
    %134 = vector.extract_strided_slice %131 {offsets = [0, 64], sizes = [1, 32], strides = [1, 1]} : vector<1x128xf32> to vector<1x32xf32>
    %135 = vector.extract_strided_slice %131 {offsets = [0, 96], sizes = [1, 32], strides = [1, 1]} : vector<1x128xf32> to vector<1x32xf32>
    %136 = arith.mulf %133, %124 : vector<1x32xf32>
    %137 = arith.mulf %132, %134 : vector<1x32xf32>
    %138 = arith.addf %136, %137 : vector<1x32xf32>
    %139 = math.tanh %138 : vector<1x32xf32>
    %140 = arith.mulf %135, %139 : vector<1x32xf32>
    %cst_26 = arith.constant dense<0.000000e+00> : vector<1x128xf32>
    %141 = tpu.matmul %140, %0, %cst_26 {dimension_numbers = #tpu.dot_dimension_numbers<[1], [0], [0], [1], [0, 0, 1, 1], [], []>} : vector<1x32xf32>, vector<32x128xf32>, vector<1x128xf32> -> vector<1x128xf32>
    %142 = arith.addf %40, %141 : vector<1x128xf32>
    %143 = math.tanh %142 : vector<1x128xf32>
    %144 = arith.mulf %143, %13 : vector<1x128xf32>
    %145 = arith.addf %144, %16 : vector<1x128xf32>
    %146 = vector.extract_strided_slice %145 {offsets = [0, 0], sizes = [1, 32], strides = [1, 1]} : vector<1x128xf32> to vector<1x32xf32>
    %147 = vector.extract_strided_slice %145 {offsets = [0, 32], sizes = [1, 32], strides = [1, 1]} : vector<1x128xf32> to vector<1x32xf32>
    %148 = vector.extract_strided_slice %145 {offsets = [0, 64], sizes = [1, 32], strides = [1, 1]} : vector<1x128xf32> to vector<1x32xf32>
    %149 = vector.extract_strided_slice %145 {offsets = [0, 96], sizes = [1, 32], strides = [1, 1]} : vector<1x128xf32> to vector<1x32xf32>
    %150 = arith.mulf %147, %138 : vector<1x32xf32>
    %151 = arith.mulf %146, %148 : vector<1x32xf32>
    %152 = arith.addf %150, %151 : vector<1x32xf32>
    %153 = math.tanh %152 : vector<1x32xf32>
    %154 = arith.mulf %149, %153 : vector<1x32xf32>
    %cst_27 = arith.constant 0.000000e+00 : f32
    %155 = vector.broadcast %cst_27 : f32 to vector<1x32xf32>
    %cst_28 = arith.constant 0.000000e+00 : f32
    %156 = vector.broadcast %cst_28 : f32 to vector<1x32xf32>
    %157 = tpu.concatenate %56, %155 in 1 : vector<1x32xf32>, vector<1x32xf32> -> vector<1x64xf32>
    %cst_29 = arith.constant dense<0.000000e+00> : vector<1x128xf32>
    %158 = tpu.matmul %157, %1, %cst_29 {dimension_numbers = #tpu.dot_dimension_numbers<[1], [0], [0], [1], [0, 0, 1, 1], [], []>} : vector<1x64xf32>, vector<64x128xf32>, vector<1x128xf32> -> vector<1x128xf32>
    %159 = arith.addf %158, %2 : vector<1x128xf32>
    %160 = math.tanh %159 : vector<1x128xf32>
    %161 = arith.mulf %160, %13 : vector<1x128xf32>
    %162 = arith.addf %161, %16 : vector<1x128xf32>
    %163 = vector.extract_strided_slice %162 {offsets = [0, 0], sizes = [1, 32], strides = [1, 1]} : vector<1x128xf32> to vector<1x32xf32>
    %164 = vector.extract_strided_slice %162 {offsets = [0, 32], sizes = [1, 32], strides = [1, 1]} : vector<1x128xf32> to vector<1x32xf32>
    %165 = vector.extract_strided_slice %162 {offsets = [0, 64], sizes = [1, 32], strides = [1, 1]} : vector<1x128xf32> to vector<1x32xf32>
    %166 = vector.extract_strided_slice %162 {offsets = [0, 96], sizes = [1, 32], strides = [1, 1]} : vector<1x128xf32> to vector<1x32xf32>
    %167 = arith.mulf %164, %156 : vector<1x32xf32>
    %168 = arith.mulf %163, %165 : vector<1x32xf32>
    %169 = arith.addf %167, %168 : vector<1x32xf32>
    %170 = math.tanh %169 : vector<1x32xf32>
    %171 = arith.mulf %166, %170 : vector<1x32xf32>
    %cst_30 = arith.constant dense<0.000000e+00> : vector<1x128xf32>
    %172 = tpu.matmul %171, %3, %cst_30 {dimension_numbers = #tpu.dot_dimension_numbers<[1], [0], [0], [1], [0, 0, 1, 1], [], []>} : vector<1x32xf32>, vector<32x128xf32>, vector<1x128xf32> -> vector<1x128xf32>
    %173 = arith.addf %172, %4 : vector<1x128xf32>
    %174 = tpu.concatenate %70, %171 in 1 : vector<1x32xf32>, vector<1x32xf32> -> vector<1x64xf32>
    %cst_31 = arith.constant dense<0.000000e+00> : vector<1x128xf32>
    %175 = tpu.matmul %174, %1, %cst_31 {dimension_numbers = #tpu.dot_dimension_numbers<[1], [0], [0], [1], [0, 0, 1, 1], [], []>} : vector<1x64xf32>, vector<64x128xf32>, vector<1x128xf32> -> vector<1x128xf32>
    %176 = arith.addf %175, %2 : vector<1x128xf32>
    %177 = math.tanh %176 : vector<1x128xf32>
    %178 = arith.mulf %177, %13 : vector<1x128xf32>
    %179 = arith.addf %178, %16 : vector<1x128xf32>
    %180 = vector.extract_strided_slice %179 {offsets = [0, 0], sizes = [1, 32], strides = [1, 1]} : vector<1x128xf32> to vector<1x32xf32>
    %181 = vector.extract_strided_slice %179 {offsets = [0, 32], sizes = [1, 32], strides = [1, 1]} : vector<1x128xf32> to vector<1x32xf32>
    %182 = vector.extract_strided_slice %179 {offsets = [0, 64], sizes = [1, 32], strides = [1, 1]} : vector<1x128xf32> to vector<1x32xf32>
    %183 = vector.extract_strided_slice %179 {offsets = [0, 96], sizes = [1, 32], strides = [1, 1]} : vector<1x128xf32> to vector<1x32xf32>
    %184 = arith.mulf %181, %169 : vector<1x32xf32>
    %185 = arith.mulf %180, %182 : vector<1x32xf32>
    %186 = arith.addf %184, %185 : vector<1x32xf32>
    %187 = math.tanh %186 : vector<1x32xf32>
    %188 = arith.mulf %183, %187 : vector<1x32xf32>
    %cst_32 = arith.constant dense<0.000000e+00> : vector<1x128xf32>
    %189 = tpu.matmul %188, %3, %cst_32 {dimension_numbers = #tpu.dot_dimension_numbers<[1], [0], [0], [1], [0, 0, 1, 1], [], []>} : vector<1x32xf32>, vector<32x128xf32>, vector<1x128xf32> -> vector<1x128xf32>
    %190 = arith.addf %189, %4 : vector<1x128xf32>
    %191 = tpu.concatenate %84, %188 in 1 : vector<1x32xf32>, vector<1x32xf32> -> vector<1x64xf32>
    %cst_33 = arith.constant dense<0.000000e+00> : vector<1x128xf32>
    %192 = tpu.matmul %191, %1, %cst_33 {dimension_numbers = #tpu.dot_dimension_numbers<[1], [0], [0], [1], [0, 0, 1, 1], [], []>} : vector<1x64xf32>, vector<64x128xf32>, vector<1x128xf32> -> vector<1x128xf32>
    %193 = arith.addf %192, %2 : vector<1x128xf32>
    %194 = math.tanh %193 : vector<1x128xf32>
    %195 = arith.mulf %194, %13 : vector<1x128xf32>
    %196 = arith.addf %195, %16 : vector<1x128xf32>
    %197 = vector.extract_strided_slice %196 {offsets = [0, 0], sizes = [1, 32], strides = [1, 1]} : vector<1x128xf32> to vector<1x32xf32>
    %198 = vector.extract_strided_slice %196 {offsets = [0, 32], sizes = [1, 32], strides = [1, 1]} : vector<1x128xf32> to vector<1x32xf32>
    %199 = vector.extract_strided_slice %196 {offsets = [0, 64], sizes = [1, 32], strides = [1, 1]} : vector<1x128xf32> to vector<1x32xf32>
    %200 = vector.extract_strided_slice %196 {offsets = [0, 96], sizes = [1, 32], strides = [1, 1]} : vector<1x128xf32> to vector<1x32xf32>
    %201 = arith.mulf %198, %186 : vector<1x32xf32>
    %202 = arith.mulf %197, %199 : vector<1x32xf32>
    %203 = arith.addf %201, %202 : vector<1x32xf32>
    %204 = math.tanh %203 : vector<1x32xf32>
    %205 = arith.mulf %200, %204 : vector<1x32xf32>
    %cst_34 = arith.constant dense<0.000000e+00> : vector<1x128xf32>
    %206 = tpu.matmul %205, %3, %cst_34 {dimension_numbers = #tpu.dot_dimension_numbers<[1], [0], [0], [1], [0, 0, 1, 1], [], []>} : vector<1x32xf32>, vector<32x128xf32>, vector<1x128xf32> -> vector<1x128xf32>
    %207 = arith.addf %206, %4 : vector<1x128xf32>
    %208 = tpu.concatenate %98, %205 in 1 : vector<1x32xf32>, vector<1x32xf32> -> vector<1x64xf32>
    %cst_35 = arith.constant dense<0.000000e+00> : vector<1x128xf32>
    %209 = tpu.matmul %208, %1, %cst_35 {dimension_numbers = #tpu.dot_dimension_numbers<[1], [0], [0], [1], [0, 0, 1, 1], [], []>} : vector<1x64xf32>, vector<64x128xf32>, vector<1x128xf32> -> vector<1x128xf32>
    %210 = arith.addf %209, %2 : vector<1x128xf32>
    %211 = math.tanh %210 : vector<1x128xf32>
    %212 = arith.mulf %211, %13 : vector<1x128xf32>
    %213 = arith.addf %212, %16 : vector<1x128xf32>
    %214 = vector.extract_strided_slice %213 {offsets = [0, 0], sizes = [1, 32], strides = [1, 1]} : vector<1x128xf32> to vector<1x32xf32>
    %215 = vector.extract_strided_slice %213 {offsets = [0, 32], sizes = [1, 32], strides = [1, 1]} : vector<1x128xf32> to vector<1x32xf32>
    %216 = vector.extract_strided_slice %213 {offsets = [0, 64], sizes = [1, 32], strides = [1, 1]} : vector<1x128xf32> to vector<1x32xf32>
    %217 = vector.extract_strided_slice %213 {offsets = [0, 96], sizes = [1, 32], strides = [1, 1]} : vector<1x128xf32> to vector<1x32xf32>
    %218 = arith.mulf %215, %203 : vector<1x32xf32>
    %219 = arith.mulf %214, %216 : vector<1x32xf32>
    %220 = arith.addf %218, %219 : vector<1x32xf32>
    %221 = math.tanh %220 : vector<1x32xf32>
    %222 = arith.mulf %217, %221 : vector<1x32xf32>
    %cst_36 = arith.constant dense<0.000000e+00> : vector<1x128xf32>
    %223 = tpu.matmul %222, %3, %cst_36 {dimension_numbers = #tpu.dot_dimension_numbers<[1], [0], [0], [1], [0, 0, 1, 1], [], []>} : vector<1x32xf32>, vector<32x128xf32>, vector<1x128xf32> -> vector<1x128xf32>
    %224 = arith.addf %223, %4 : vector<1x128xf32>
    %225 = tpu.concatenate %112, %222 in 1 : vector<1x32xf32>, vector<1x32xf32> -> vector<1x64xf32>
    %cst_37 = arith.constant dense<0.000000e+00> : vector<1x128xf32>
    %226 = tpu.matmul %225, %1, %cst_37 {dimension_numbers = #tpu.dot_dimension_numbers<[1], [0], [0], [1], [0, 0, 1, 1], [], []>} : vector<1x64xf32>, vector<64x128xf32>, vector<1x128xf32> -> vector<1x128xf32>
    %227 = arith.addf %226, %2 : vector<1x128xf32>
    %228 = math.tanh %227 : vector<1x128xf32>
    %229 = arith.mulf %228, %13 : vector<1x128xf32>
    %230 = arith.addf %229, %16 : vector<1x128xf32>
    %231 = vector.extract_strided_slice %230 {offsets = [0, 0], sizes = [1, 32], strides = [1, 1]} : vector<1x128xf32> to vector<1x32xf32>
    %232 = vector.extract_strided_slice %230 {offsets = [0, 32], sizes = [1, 32], strides = [1, 1]} : vector<1x128xf32> to vector<1x32xf32>
    %233 = vector.extract_strided_slice %230 {offsets = [0, 64], sizes = [1, 32], strides = [1, 1]} : vector<1x128xf32> to vector<1x32xf32>
    %234 = vector.extract_strided_slice %230 {offsets = [0, 96], sizes = [1, 32], strides = [1, 1]} : vector<1x128xf32> to vector<1x32xf32>
    %235 = arith.mulf %232, %220 : vector<1x32xf32>
    %236 = arith.mulf %231, %233 : vector<1x32xf32>
    %237 = arith.addf %235, %236 : vector<1x32xf32>
    %238 = math.tanh %237 : vector<1x32xf32>
    %239 = arith.mulf %234, %238 : vector<1x32xf32>
    %cst_38 = arith.constant dense<0.000000e+00> : vector<1x128xf32>
    %240 = tpu.matmul %239, %3, %cst_38 {dimension_numbers = #tpu.dot_dimension_numbers<[1], [0], [0], [1], [0, 0, 1, 1], [], []>} : vector<1x32xf32>, vector<32x128xf32>, vector<1x128xf32> -> vector<1x128xf32>
    %241 = arith.addf %240, %4 : vector<1x128xf32>
    %242 = tpu.concatenate %126, %239 in 1 : vector<1x32xf32>, vector<1x32xf32> -> vector<1x64xf32>
    %cst_39 = arith.constant dense<0.000000e+00> : vector<1x128xf32>
    %243 = tpu.matmul %242, %1, %cst_39 {dimension_numbers = #tpu.dot_dimension_numbers<[1], [0], [0], [1], [0, 0, 1, 1], [], []>} : vector<1x64xf32>, vector<64x128xf32>, vector<1x128xf32> -> vector<1x128xf32>
    %244 = arith.addf %243, %2 : vector<1x128xf32>
    %245 = math.tanh %244 : vector<1x128xf32>
    %246 = arith.mulf %245, %13 : vector<1x128xf32>
    %247 = arith.addf %246, %16 : vector<1x128xf32>
    %248 = vector.extract_strided_slice %247 {offsets = [0, 0], sizes = [1, 32], strides = [1, 1]} : vector<1x128xf32> to vector<1x32xf32>
    %249 = vector.extract_strided_slice %247 {offsets = [0, 32], sizes = [1, 32], strides = [1, 1]} : vector<1x128xf32> to vector<1x32xf32>
    %250 = vector.extract_strided_slice %247 {offsets = [0, 64], sizes = [1, 32], strides = [1, 1]} : vector<1x128xf32> to vector<1x32xf32>
    %251 = vector.extract_strided_slice %247 {offsets = [0, 96], sizes = [1, 32], strides = [1, 1]} : vector<1x128xf32> to vector<1x32xf32>
    %252 = arith.mulf %249, %237 : vector<1x32xf32>
    %253 = arith.mulf %248, %250 : vector<1x32xf32>
    %254 = arith.addf %252, %253 : vector<1x32xf32>
    %255 = math.tanh %254 : vector<1x32xf32>
    %256 = arith.mulf %251, %255 : vector<1x32xf32>
    %cst_40 = arith.constant dense<0.000000e+00> : vector<1x128xf32>
    %257 = tpu.matmul %256, %3, %cst_40 {dimension_numbers = #tpu.dot_dimension_numbers<[1], [0], [0], [1], [0, 0, 1, 1], [], []>} : vector<1x32xf32>, vector<32x128xf32>, vector<1x128xf32> -> vector<1x128xf32>
    %258 = arith.addf %257, %4 : vector<1x128xf32>
    %259 = tpu.concatenate %140, %256 in 1 : vector<1x32xf32>, vector<1x32xf32> -> vector<1x64xf32>
    %cst_41 = arith.constant dense<0.000000e+00> : vector<1x128xf32>
    %260 = tpu.matmul %259, %1, %cst_41 {dimension_numbers = #tpu.dot_dimension_numbers<[1], [0], [0], [1], [0, 0, 1, 1], [], []>} : vector<1x64xf32>, vector<64x128xf32>, vector<1x128xf32> -> vector<1x128xf32>
    %261 = arith.addf %260, %2 : vector<1x128xf32>
    %262 = math.tanh %261 : vector<1x128xf32>
    %263 = arith.mulf %262, %13 : vector<1x128xf32>
    %264 = arith.addf %263, %16 : vector<1x128xf32>
    %265 = vector.extract_strided_slice %264 {offsets = [0, 0], sizes = [1, 32], strides = [1, 1]} : vector<1x128xf32> to vector<1x32xf32>
    %266 = vector.extract_strided_slice %264 {offsets = [0, 32], sizes = [1, 32], strides = [1, 1]} : vector<1x128xf32> to vector<1x32xf32>
    %267 = vector.extract_strided_slice %264 {offsets = [0, 64], sizes = [1, 32], strides = [1, 1]} : vector<1x128xf32> to vector<1x32xf32>
    %268 = vector.extract_strided_slice %264 {offsets = [0, 96], sizes = [1, 32], strides = [1, 1]} : vector<1x128xf32> to vector<1x32xf32>
    %269 = arith.mulf %266, %254 : vector<1x32xf32>
    %270 = arith.mulf %265, %267 : vector<1x32xf32>
    %271 = arith.addf %269, %270 : vector<1x32xf32>
    %272 = math.tanh %271 : vector<1x32xf32>
    %273 = arith.mulf %268, %272 : vector<1x32xf32>
    %cst_42 = arith.constant dense<0.000000e+00> : vector<1x128xf32>
    %274 = tpu.matmul %273, %3, %cst_42 {dimension_numbers = #tpu.dot_dimension_numbers<[1], [0], [0], [1], [0, 0, 1, 1], [], []>} : vector<1x32xf32>, vector<32x128xf32>, vector<1x128xf32> -> vector<1x128xf32>
    %275 = arith.addf %274, %4 : vector<1x128xf32>
    %276 = tpu.concatenate %154, %273 in 1 : vector<1x32xf32>, vector<1x32xf32> -> vector<1x64xf32>
    %cst_43 = arith.constant dense<0.000000e+00> : vector<1x128xf32>
    %277 = tpu.matmul %276, %1, %cst_43 {dimension_numbers = #tpu.dot_dimension_numbers<[1], [0], [0], [1], [0, 0, 1, 1], [], []>} : vector<1x64xf32>, vector<64x128xf32>, vector<1x128xf32> -> vector<1x128xf32>
    %278 = arith.addf %277, %2 : vector<1x128xf32>
    %279 = math.tanh %278 : vector<1x128xf32>
    %280 = arith.mulf %279, %13 : vector<1x128xf32>
    %281 = arith.addf %280, %16 : vector<1x128xf32>
    %282 = vector.extract_strided_slice %281 {offsets = [0, 0], sizes = [1, 32], strides = [1, 1]} : vector<1x128xf32> to vector<1x32xf32>
    %283 = vector.extract_strided_slice %281 {offsets = [0, 32], sizes = [1, 32], strides = [1, 1]} : vector<1x128xf32> to vector<1x32xf32>
    %284 = vector.extract_strided_slice %281 {offsets = [0, 64], sizes = [1, 32], strides = [1, 1]} : vector<1x128xf32> to vector<1x32xf32>
    %285 = vector.extract_strided_slice %281 {offsets = [0, 96], sizes = [1, 32], strides = [1, 1]} : vector<1x128xf32> to vector<1x32xf32>
    %286 = arith.mulf %283, %271 : vector<1x32xf32>
    %287 = arith.mulf %282, %284 : vector<1x32xf32>
    %288 = arith.addf %286, %287 : vector<1x32xf32>
    %289 = math.tanh %288 : vector<1x32xf32>
    %290 = arith.mulf %285, %289 : vector<1x32xf32>
    %cst_44 = arith.constant dense<0.000000e+00> : vector<1x128xf32>
    %291 = tpu.matmul %290, %3, %cst_44 {dimension_numbers = #tpu.dot_dimension_numbers<[1], [0], [0], [1], [0, 0, 1, 1], [], []>} : vector<1x32xf32>, vector<32x128xf32>, vector<1x128xf32> -> vector<1x128xf32>
    %292 = arith.addf %291, %4 : vector<1x128xf32>
    %293 = tpu.concatenate %173, %190, %207, %224, %241, %258, %275, %292 in 0 : vector<1x128xf32>, vector<1x128xf32>, vector<1x128xf32>, vector<1x128xf32>, vector<1x128xf32>, vector<1x128xf32>, vector<1x128xf32>, vector<1x128xf32> -> vector<8x128xf32>
    %cst_45 = arith.constant dense<0xFF800000> : vector<8xf32>
    %294 = vector.multi_reduction <maximumf>, %293, %cst_45 [1] : vector<8x128xf32> to vector<8xf32>
    %295 = vector.shape_cast %294 : vector<8xf32> to vector<8x1xf32>
    %296 = vector.broadcast %295 : vector<8x1xf32> to vector<8x128xf32>
    %297 = arith.subf %293, %296 : vector<8x128xf32>
    %298 = math.exp %297 : vector<8x128xf32>
    %cst_46 = arith.constant dense<0.000000e+00> : vector<8xf32>
    %299 = vector.multi_reduction <add>, %298, %cst_46 [1] : vector<8x128xf32> to vector<8xf32>
    %300 = vector.shape_cast %299 : vector<8xf32> to vector<8x1xf32>
    %301 = math.log %300 : vector<8x1xf32>
    %302 = vector.broadcast %301 : vector<8x1xf32> to vector<8x128xf32>
    %303 = arith.subf %297, %302 : vector<8x128xf32>
    %c0_47 = arith.constant 0 : index
    %c0_48 = arith.constant 0 : index
    %304 = vector.load %arg3[%c0_47, %c0_48] : memref<8x128xf32, #tpu.memory_space<vmem>>, vector<8x128xf32>
    tpu.vector_store %arg3[%c0_47, %c0_48], %303 {strides = array<i32>} : memref<8x128xf32, #tpu.memory_space<vmem>>, vector<8x128xf32>,
    return
  }
}

</mosaic_0001>

<bundles_post_ra>
// kernel: tpu_custom_call.1
= control target key start
LH: loop header
LB: loop body
LE: loop exit
PB: predicated region body
PF: predicated region fallthrough
CT: control target
= control target key end

     0   :  { %8 = vsyncpa [#allocation5], 0  ;;  %s3579_s0 = inlined_call_operand.hbm [shape: s32[8], index: 0, kind: input, shape index: {}]   ;;  %s3580_s1 = inlined_call_operand.hbm [shape: f32[50,128], index: 1, kind: input, shape index: {}]   ;;  %s3581_s2 = inlined_call_operand.hbm [shape: f32[144,128], index: 2, kind: input, shape index: {}]   ;;  %s3582_s3 = inlined_call_operand.hbm [shape: f32[8,128], index: 3, kind: output, shape index: {}]  }
   0x1   :  { %9 = vsyncpa [#allocation3], 0 }
   0x2   :  { %10 = vsyncpa [#allocation8], 0 }
   0x3   :  { %11 = vsyncpa [#allocation4], 0  ;;  %s2991_s12 = smov [#allocation2]   ;;  %s2992_s15 = smov [#allocation6]  }
   0x4   :  { %19 = dma.hbm_to_smem %s3579_s0, 16, %s2991_s12, [#allocation5]  }
   0x5   :  { %s25_s16 = sshll.u32 %s2992_s15, 4  ;;  %s26_s16 = int_to_ptr.vmem [resolvable:$true] %s25_s16 }
   0x6   :  { %s2931_s17 = scalar_lea.vmem %s26_s16, 896  ;;  %p2936_p1 = scmp.lt.s32.totalorder %s26_s16, %s26_s16 }
   0x7   :  { %p2932_p0 = scmp.ne.s32.totalorder %s26_s16, %s2931_s17  ;;  %p2937_p2 = scmp.lt.s32.totalorder %s2931_s17, %s2931_s17 }
   0x9   :  { %p2938_p3 = por %p2937_p2, %p2936_p1 }
   0xb   :  { %p2939_p4 = pnand %p2938_p3, %p2932_p0 }
   0xd   :  { %2942 = shalt.err (!%p2939_p4)
}
   0xe   :  { %s2993_s18 = smov 128   ;;  %s2994_s19 = smov 8  }
   0xf   :  { %31 = dma.hbm_to_vmem [thread:$0]  %s3580_s1, 896, %s26_s16, [#allocation3], %s2993_s18, %s2993_s18, %s2994_s19  }
  0x10   :  { %s2995_s22 = smov [#allocation7]  }
  0x11   :  { %s37_s23 = sshll.u32 %s2995_s22, 4  ;;  %s38_s23 = int_to_ptr.vmem [resolvable:$true] %s37_s23 }
  0x12   :  { %s2951_s0 = scalar_lea.vmem %s38_s23, 2304  ;;  %p2956_p6 = scmp.lt.s32.totalorder %s38_s23, %s38_s23 }
  0x13   :  { %p2952_p5 = scmp.ne.s32.totalorder %s38_s23, %s2951_s0  ;;  %p2957_p7 = scmp.lt.s32.totalorder %s2951_s0, %s2951_s0 }
  0x15   :  { %p2958_p8 = por %p2957_p7, %p2956_p6 }
  0x17   :  { %p2959_p9 = pnand %p2958_p8, %p2952_p5 }
  0x19   :  { %2962 = shalt.err (!%p2959_p9)
}
  0x1a   :  { %43 = dma.hbm_to_vmem [thread:$0]  %s3581_s2, 2304, %s38_s23, [#allocation8], %s2993_s18, %s2993_s18, %s2994_s19  }
  0x1b   :  { %2983 = dma.done.wait [#allocation5], 16  }
  0x1c   :  { %2984 = vsyncadd [#allocation5], 4294967280 }
  0x1d   :  { %2985 = dma.done.wait [#allocation3], 896  }
  0x1e   :  { %2986 = vsyncadd [#allocation3], 4294966400 }
  0x1f   :  { %2987 = dma.done.wait [#allocation8], 2304  }
  0x20   :  { %2988 = vsyncadd [#allocation8], 4294964992 }
  0x21   :  { %53 = sfence }
  0x22   :  { %v3031_v0 = vld [vmem:[#allocation7 + $0x18] sm:$0xff]  ;;  %v2996_v1 = vmov 0.0   ;;  %v3034_v2 = vld [vmem:[#allocation7 + $0x10] sm:$0xff]  ;;  %vm2997_vm0 = vmmov 0   ;;  %v3041_v3 = vld [vmem:[#allocation7 + $0x8] sm:$0xff]  ;;  %s79_s1 = sld [smem:[#allocation2]]  ;;  %v72_v7 = vlaneseq }
  0x23   :  { %2508 = vmatprep.subr.mxu0 %v2996_v1  ;;  %2516 = vmatprep.mubr.msk.f32.mxu0 %vm2997_vm0, %v2996_v1  ;;  %v3047_v4 = vld [vmem:[#allocation7] sm:$0xff]  ;;  %v2998_v11 = vmov 0.5   ;;  %s2999_s26 = smov 64   ;;  %s3000_s27 = smov 32   ;;  %vm103_vm4 = vcmask 261120   ;;  %vm872_vm5 = vcmask 523264  }
  0x24   :  { %2509 = vmatpush3.msra.mxu0 %v3031_v0  ;;  %2519 = vmatprep.subr.mxu1 %v2996_v1  ;;  %v73_v10 = vand.u32 127, %v72_v7  ;;  %s2326_s28 = sld [smem:[#allocation2 + $0x1]]  ;;  %vm2276_vm6 = vcmask 1040384   ;;  %vm2278_vm7 = vcmask 1041408   ;;  %vm2280_vm8 = vcmask 1042432   ;;  %s3001_s15 = smov [#allocation9]  }
  0x25   :  { %2510 = vmatprep.subr.mxu0 %v2996_v1  ;;  %2520 = vmatpush3.msra.mxu1 %v3031_v0  ;;  %s2327_s30 = sld [smem:[#allocation2 + $0x2]]  ;;  %vm2282_vm9 = vcmask 1043456   ;;  %vm2284_vm10 = vcmask 1044480   ;;  %vm2286_vm11 = vcmask 1045504   ;;  %vm2288_vm12 = vcmask 1046528   ;;  %s2307_s16 = sshll.u32 %s3001_s15, 4  ;;  %s2308_s16 = int_to_ptr.vmem [resolvable:$true] %s2307_s16 }
  0x26   :  { %2511 = vmatpush3.msra.mxu0 %v3034_v2  ;;  %2521 = vmatprep.subr.mxu1 %v2996_v1  ;;  %vm74_vm1 = vcmp.ge.s32.totalorder %v73_v10, 64  ;;  %vm75_vm2 = vcmp.lt.s32.totalorder %v73_v10, 96  ;;  %s2328_s5 = sld [smem:[#allocation2 + $0x3]]  ;;  %s2963_s17 = scalar_lea.vmem %s2308_s16, 128 }
  0x27   :  { %2512 = vmatprep.subr.mxu0 %v2996_v1  ;;  %2522 = vmatpush3.msra.mxu1 %v3034_v2  ;;  %vm76_vm3 = vmand %vm74_vm1, %vm75_vm2  ;;  %s2329_s7 = sld [smem:[#allocation2 + $0x4]]  ;;  %p2964_p10 = scmp.ne.s32.totalorder %s2308_s16, %s2963_s17 }
  0x28   :  { %2513 = vmatpush3.msra.mxu0 %v3041_v3  ;;  %2523 = vmatprep.subr.mxu1 %v2996_v1  ;;  %s80_s2 = scalar_lea.vmem [#allocation6], %s79_s1  ;;  %v3072_v12 = vsel %vm76_vm3, 1.0, %v2998_v11  ;;  %v3074_v14 = vsel %vm76_vm3, 0.0, %v2998_v11  ;;  %s2330_s9 = sld [smem:[#allocation2 + $0x5]] }
  0x29   :  { %2514 = vmatprep.subr.mxu0 %v2996_v1  ;;  %2524 = vmatpush3.msra.mxu1 %v3041_v3  ;;  %v81_v5 = vld [vmem:[%s80_s2] sm:$0x1]  ;;  %s2331_s11 = sld [smem:[#allocation2 + $0x6]]  ;;  %p2968_p11 = scmp.lt.s32.totalorder %s2308_s16, %s2308_s16 }
  0x2a   :  { %2515 = vmatpush3.msra.mxu0 %v3047_v4  ;;  %2525 = vmatprep.subr.mxu1 %v2996_v1  ;;  %s83_s29 = scalar_lea.vmem [#allocation6], %s2326_s28  ;;  %s2332_s13 = sld [smem:[#allocation2 + $0x7]] }
  0x2b   :  { %2517 = vmatmul.mubr.f32.vlgmr.msra.gmra.mxu0 %v2996_v1  ;;  %2526 = vmatpush3.msra.mxu1 %v3047_v4  ;;  %v84_v26 = vld [vmem:[%s83_s29] sm:$0x1]  ;;  %s86_s4 = scalar_lea.vmem [#allocation6], %s2327_s30  ;;  %p2969_p12 = scmp.lt.s32.totalorder %s2963_s17, %s2963_s17 }
  0x2c   :  { %2527 = vmatprep.mubr.msk.f32.mxu1 %vm2997_vm0, %v2996_v1  ;;  %2530 = vmatprep.subr.mxu0 %v2996_v1  ;;  %v87_v42 = vld [vmem:[%s86_s4] sm:$0x1]  ;;  %s89_s6 = scalar_lea.vmem [#allocation6], %s2328_s5 }
  0x2d   :  { %2531 = vmatpush3.msra.mxu0 %v3031_v0  ;;  %2538 = vmatprep.mubr.msk.f32.mxu0 %vm2997_vm0, %v2996_v1  ;;  %v90_v58 = vld [vmem:[%s89_s6] sm:$0x1]  ;;  %s92_s8 = scalar_lea.vmem [#allocation6], %s2329_s7  ;;  %p2970_p13 = por %p2969_p12, %p2968_p11 }
  0x2e   :  { %2532 = vmatprep.subr.mxu0 %v2996_v1  ;;  %2541 = vmatprep.subr.mxu1 %v2996_v1  ;;  %s95_s10 = scalar_lea.vmem [#allocation6], %s2330_s9 }
  0x2f   :  { %2533 = vmatpush3.msra.mxu0 %v3034_v2  ;;  %s98_s12 = scalar_lea.vmem [#allocation6], %s2331_s11  ;;  %p2971_p0 = pnand %p2970_p13, %p2964_p10 }
  0x30   :  { %2534 = vmatprep.subr.mxu0 %v2996_v1  ;;  %s101_s14 = scalar_lea.vmem [#allocation6], %s2332_s13 }
  0x31   :  { %2535 = vmatpush3.msra.mxu0 %v3041_v3 }
  0x32   :  { %2536 = vmatprep.subr.mxu0 %v2996_v1 }
  0x33   :  { %2537 = vmatpush3.msra.mxu0 %v3047_v4 }
  0x34   :  { %2552 = vmatprep.subr.mxu0 %v2996_v1 }
  0xeb   :  { %v173_v6 = vpop.f32.mrf.mxu0 }
  0xec   :  { %v177_v8 = vadd.f32 %v173_v6, %v81_v5 }
  0xed   :  { %v2518_v9 = vpop.f32.mrf.mxu0 }
  0xee   :  { %2847 = vtanh.f32 %v177_v8 }
  0xfb   :  { %v2848_v13 = vpop.eup %2847 }
  0xfc   :  { %v179_v15 = vmul.f32 %v2848_v13, %v3072_v12 }
  0xfe   :  { %v180_v16 = vadd.f32 %v179_v15, %v3074_v14 }
 0x100   :  { %183 = vrot.lane.b32.xlu0 %v180_v16, %s2999_s26  ;;  %v181_v19 = vmul.f32 0.0, %v180_v16 }
 0x172   :  { %v184_v17 = vpop.permute.xlu0 %183 }
 0x173   :  { %v186_v18 = vmul.f32 %v184_v17, %v180_v16  ;;  %v93_v17 = vld [vmem:[%s92_s8] sm:$0x1] }
 0x175   :  { %188 = vrot.lane.b32.xlu0 %v186_v18, %s3000_s27 }
 0x1e7   :  { %v189_v20 = vpop.permute.xlu0 %188 }
 0x1e8   :  { %v191_v21 = vadd.f32 %v189_v20, %v181_v19 }
 0x1ea   :  { %2849 = vtanh.f32 %v191_v21 }
 0x1f7   :  { %v2850_v22 = vpop.eup %2849 }
 0x1f8   :  { %194 = vrot.lane.b32.xlu1 %v2850_v22, %s2999_s26 }
 0x26a   :  { %v195_v23 = vpop.permute.xlu1 %194 }
 0x26b   :  { %v197_v24 = vmul.f32 %v195_v23, %v180_v16 }
 0x26d   :  { %199 = vrot.lane.b32.xlu1 %v197_v24, %s3000_s27 }
 0x2df   :  { %v3082_v25 = vpop.permute.xlu1 %199 }
 0x2e0   :  { %2528 = vmatmul.mubr.msk.f32.vlgmr.msra.gmra.mxu1 %vm103_vm4, %v3082_v25 }
 0x2e1   :  { %2542 = vmatpush3.msra.mxu1 %v3031_v0  ;;  %2549 = vmatprep.mubr.msk.f32.mxu1 %vm2997_vm0, %v2996_v1 }
 0x2e2   :  { %2543 = vmatprep.subr.mxu1 %v2996_v1 }
 0x2e3   :  { %2544 = vmatpush3.msra.mxu1 %v3034_v2 }
 0x2e4   :  { %2545 = vmatprep.subr.mxu1 %v2996_v1 }
 0x2e5   :  { %2546 = vmatpush3.msra.mxu1 %v3041_v3 }
 0x2e6   :  { %2547 = vmatprep.subr.mxu1 %v2996_v1 }
 0x2e7   :  { %2548 = vmatpush3.msra.mxu1 %v3047_v4 }
 0x2e8   :  { %2563 = vmatprep.subr.mxu1 %v2996_v1 }
 0x3a0   :  { %v269_v27 = vpop.f32.mrf.mxu1 }
 0x3a1   :  { %v273_v28 = vadd.f32 %v269_v27, %v84_v26 }
 0x3a2   :  { %v2529_v29 = vpop.f32.mrf.mxu1 }
 0x3a3   :  { %2851 = vtanh.f32 %v273_v28 }
 0x3b0   :  { %v2852_v30 = vpop.eup %2851 }
 0x3b1   :  { %v275_v31 = vmul.f32 %v2852_v30, %v3072_v12 }
 0x3b3   :  { %v276_v32 = vadd.f32 %v275_v31, %v3074_v14 }
 0x3b5   :  { %279 = vrot.lane.b32.xlu0 %v276_v32, %s2999_s26  ;;  %v277_v35 = vmul.f32 %v276_v32, %v191_v21 }
 0x427   :  { %v280_v33 = vpop.permute.xlu0 %279 }
 0x428   :  { %v282_v34 = vmul.f32 %v280_v33, %v276_v32 }
 0x42a   :  { %284 = vrot.lane.b32.xlu1 %v282_v34, %s3000_s27 }
 0x49c   :  { %v285_v36 = vpop.permute.xlu1 %284 }
 0x49d   :  { %v287_v37 = vadd.f32 %v285_v36, %v277_v35 }
 0x49f   :  { %2853 = vtanh.f32 %v287_v37 }
 0x4ac   :  { %v2854_v38 = vpop.eup %2853 }
 0x4ad   :  { %290 = vrot.lane.b32.xlu0 %v2854_v38, %s2999_s26 }
 0x51f   :  { %v291_v39 = vpop.permute.xlu0 %290 }
 0x520   :  { %v293_v40 = vmul.f32 %v291_v39, %v276_v32 }
 0x522   :  { %295 = vrot.lane.b32.xlu1 %v293_v40, %s3000_s27 }
 0x594   :  { %v3102_v41 = vpop.permute.xlu1 %295 }
 0x595   :  { %2539 = vmatmul.mubr.msk.f32.vlgmr.msra.gmra.mxu0 %vm103_vm4, %v3102_v41 }
 0x596   :  { %2553 = vmatpush3.msra.mxu0 %v3031_v0  ;;  %2560 = vmatprep.mubr.msk.f32.mxu0 %vm2997_vm0, %v2996_v1 }
 0x597   :  { %2554 = vmatprep.subr.mxu0 %v2996_v1 }
 0x598   :  { %2555 = vmatpush3.msra.mxu0 %v3034_v2 }
 0x599   :  { %2556 = vmatprep.subr.mxu0 %v2996_v1 }
 0x59a   :  { %2557 = vmatpush3.msra.mxu0 %v3041_v3 }
 0x59b   :  { %2558 = vmatprep.subr.mxu0 %v2996_v1 }
 0x59c   :  { %2559 = vmatpush3.msra.mxu0 %v3047_v4 }
 0x59d   :  { %2574 = vmatprep.subr.mxu0 %v2996_v1 }
 0x655   :  { %v365_v43 = vpop.f32.mrf.mxu0 }
 0x656   :  { %v369_v44 = vadd.f32 %v365_v43, %v87_v42 }
 0x657   :  { %v2540_v45 = vpop.f32.mrf.mxu0 }
 0x658   :  { %2855 = vtanh.f32 %v369_v44 }
 0x665   :  { %v2856_v46 = vpop.eup %2855 }
 0x666   :  { %v371_v47 = vmul.f32 %v2856_v46, %v3072_v12  ;;  %v3185_v46 = vld [vmem:[#allocation7 + $0x58] sm:$0xff] }
 0x668   :  { %v372_v48 = vadd.f32 %v371_v47, %v3074_v14 }
 0x66a   :  { %375 = vrot.lane.b32.xlu0 %v372_v48, %s2999_s26  ;;  %v373_v51 = vmul.f32 %v372_v48, %v287_v37 }
 0x6dc   :  { %v376_v49 = vpop.permute.xlu0 %375 }
 0x6dd   :  { %v378_v50 = vmul.f32 %v376_v49, %v372_v48  ;;  %v3197_v49 = vld [vmem:[#allocation7 + $0x48] sm:$0xff] }
 0x6df   :  { %380 = vrot.lane.b32.xlu1 %v378_v50, %s3000_s27  ;;  %v3201_v50 = vld [vmem:[#allocation7 + $0x40] sm:$0xff] }
 0x751   :  { %v381_v52 = vpop.permute.xlu1 %380 }
 0x752   :  { %v383_v53 = vadd.f32 %v381_v52, %v373_v51  ;;  %v3205_v51 = vld [vmem:[#allocation7 + $0x38] sm:$0xff]  ;;  %v3209_v52 = vld [vmem:[#allocation7 + $0x30] sm:$0xff] }
 0x754   :  { %2857 = vtanh.f32 %v383_v53 }
 0x761   :  { %v2858_v54 = vpop.eup %2857 }
 0x762   :  { %386 = vrot.lane.b32.xlu0 %v2858_v54, %s2999_s26  ;;  %v3217_v54 = vld [vmem:[#allocation7 + $0x20] sm:$0xff] }
 0x7d4   :  { %v387_v55 = vpop.permute.xlu0 %386 }
 0x7d5   :  { %v389_v56 = vmul.f32 %v387_v55, %v372_v48  ;;  %v3191_v48 = vld [vmem:[#allocation7 + $0x50] sm:$0xff]  ;;  %v871_v55 = vsel %vm103_vm4, %v3082_v25, 0.0 }
 0x7d7   :  { %391 = vrot.lane.b32.xlu1 %v389_v56, %s3000_s27  ;;  %v99_v56 = vld [vmem:[%s98_s12] sm:$0x1] }
 0x849   :  { %v3122_v57 = vpop.permute.xlu1 %391 }
 0x84a   :  { %2550 = vmatmul.mubr.msk.f32.vlgmr.msra.gmra.mxu1 %vm103_vm4, %v3122_v57 }
 0x84b   :  { %2564 = vmatpush3.msra.mxu1 %v3031_v0  ;;  %2571 = vmatprep.mubr.msk.f32.mxu1 %vm2997_vm0, %v2996_v1 }
 0x84c   :  { %2565 = vmatprep.subr.mxu1 %v2996_v1 }
 0x84d   :  { %2566 = vmatpush3.msra.mxu1 %v3034_v2 }
 0x84e   :  { %2567 = vmatprep.subr.mxu1 %v2996_v1 }
 0x84f   :  { %2568 = vmatpush3.msra.mxu1 %v3041_v3 }
 0x850   :  { %2569 = vmatprep.subr.mxu1 %v2996_v1 }
 0x851   :  { %2570 = vmatpush3.msra.mxu1 %v3047_v4 }
 0x852   :  { %2585 = vmatprep.subr.mxu1 %v2996_v1 }
 0x90a   :  { %v461_v59 = vpop.f32.mrf.mxu1 }
 0x90b   :  { %v465_v60 = vadd.f32 %v461_v59, %v90_v58 }
 0x90c   :  { %v2551_v61 = vpop.f32.mrf.mxu1 }
 0x90d   :  { %2859 = vtanh.f32 %v465_v60  ;;  %v3228_v61 = vld [vmem:[#allocation7 + $0x60] sm:$0x1] }
 0x91a   :  { %v2860_v62 = vpop.eup %2859 }
 0x91b   :  { %v467_v63 = vmul.f32 %v2860_v62, %v3072_v12 }
 0x91d   :  { %v468_v5 = vadd.f32 %v467_v63, %v3074_v14 }
 0x91f   :  { %471 = vrot.lane.b32.xlu0 %v468_v5, %s2999_s26  ;;  %v469_v8 = vmul.f32 %v468_v5, %v383_v53  ;;  %v3213_v53 = vld [vmem:[#allocation7 + $0x28] sm:$0xff] }
 0x991   :  { %v472_v6 = vpop.permute.xlu0 %471 }
 0x992   :  { %v474_v7 = vmul.f32 %v472_v6, %v468_v5 }
 0x994   :  { %476 = vrot.lane.b32.xlu1 %v474_v7, %s3000_s27 }
 0xa06   :  { %v477_v9 = vpop.permute.xlu1 %476 }
 0xa07   :  { %v479_v10 = vadd.f32 %v477_v9, %v469_v8 }
 0xa09   :  { %2861 = vtanh.f32 %v479_v10 }
 0xa16   :  { %v2862_v11 = vpop.eup %2861 }
 0xa17   :  { %482 = vrot.lane.b32.xlu0 %v2862_v11, %s2999_s26 }
 0xa89   :  { %v483_v13 = vpop.permute.xlu0 %482 }
 0xa8a   :  { %v485_v15 = vmul.f32 %v483_v13, %v468_v5 }
 0xa8c   :  { %487 = vrot.lane.b32.xlu1 %v485_v15, %s3000_s27 }
 0xafe   :  { %v3142_v16 = vpop.permute.xlu1 %487 }
 0xaff   :  { %2561 = vmatmul.mubr.msk.f32.vlgmr.msra.gmra.mxu0 %vm103_vm4, %v3142_v16 }
 0xb00   :  { %2575 = vmatpush3.msra.mxu0 %v3031_v0  ;;  %2582 = vmatprep.mubr.msk.f32.mxu0 %vm2997_vm0, %v2996_v1 }
 0xb01   :  { %2576 = vmatprep.subr.mxu0 %v2996_v1 }
 0xb02   :  { %2577 = vmatpush3.msra.mxu0 %v3034_v2 }
 0xb03   :  { %2578 = vmatprep.subr.mxu0 %v2996_v1 }
 0xb04   :  { %2579 = vmatpush3.msra.mxu0 %v3041_v3 }
 0xb05   :  { %2580 = vmatprep.subr.mxu0 %v2996_v1 }
 0xb06   :  { %2581 = vmatpush3.msra.mxu0 %v3047_v4 }
 0xb07   :  { %2596 = vmatprep.subr.mxu0 %v2996_v1 }
 0xbbf   :  { %v557_v18 = vpop.f32.mrf.mxu0 }
 0xbc0   :  { %v561_v19 = vadd.f32 %v557_v18, %v93_v17 }
 0xbc1   :  { %v2562_v20 = vpop.f32.mrf.mxu0 }
 0xbc2   :  { %2863 = vtanh.f32 %v561_v19 }
 0xbcf   :  { %v2864_v21 = vpop.eup %2863 }
 0xbd0   :  { %v563_v22 = vmul.f32 %v2864_v21, %v3072_v12 }
 0xbd2   :  { %v564_v23 = vadd.f32 %v563_v22, %v3074_v14 }
 0xbd4   :  { %567 = vrot.lane.b32.xlu0 %v564_v23, %s2999_s26  ;;  %v565_v27 = vmul.f32 %v564_v23, %v479_v10 }
 0xc46   :  { %v568_v24 = vpop.permute.xlu0 %567 }
 0xc47   :  { %v570_v26 = vmul.f32 %v568_v24, %v564_v23 }
 0xc49   :  { %572 = vrot.lane.b32.xlu1 %v570_v26, %s3000_s27 }
 0xcbb   :  { %v573_v28 = vpop.permute.xlu1 %572 }
 0xcbc   :  { %v575_v29 = vadd.f32 %v573_v28, %v565_v27  ;;  %v3248_v27 = vld [vmem:[#allocation7 + $0x80] sm:$0xff]  ;;  %v3251_v28 = vld [vmem:[#allocation7 + $0x78] sm:$0xff] }
 0xcbe   :  { %2865 = vtanh.f32 %v575_v29 }
 0xccb   :  { %v2866_v30 = vpop.eup %2865 }
 0xccc   :  { %578 = vrot.lane.b32.xlu0 %v2866_v30, %s2999_s26  ;;  %v3259_v30 = vld [vmem:[#allocation7 + $0x68] sm:$0xff] }
 0xd3e   :  { %v579_v31 = vpop.permute.xlu0 %578 }
 0xd3f   :  { %v581_v32 = vmul.f32 %v579_v31, %v564_v23 }
 0xd41   :  { %583 = vrot.lane.b32.xlu1 %v581_v32, %s3000_s27 }
 0xdb3   :  { %v3162_v33 = vpop.permute.xlu1 %583 }
 0xdb4   :  { %2572 = vmatmul.mubr.msk.f32.vlgmr.msra.gmra.mxu1 %vm103_vm4, %v3162_v33 }
 0xdb5   :  { %2586 = vmatpush3.msra.mxu1 %v3031_v0  ;;  %2593 = vmatprep.mubr.msk.f32.mxu1 %vm2997_vm0, %v2996_v1  ;;  %v96_v0 = vld [vmem:[%s95_s10] sm:$0x1] }
 0xdb6   :  { %2587 = vmatprep.subr.mxu1 %v2996_v1 }
 0xdb7   :  { %2588 = vmatpush3.msra.mxu1 %v3034_v2 }
 0xdb8   :  { %2589 = vmatprep.subr.mxu1 %v2996_v1 }
 0xdb9   :  { %2590 = vmatpush3.msra.mxu1 %v3041_v3 }
 0xdba   :  { %2591 = vmatprep.subr.mxu1 %v2996_v1 }
 0xdbb   :  { %2592 = vmatpush3.msra.mxu1 %v3047_v4 }
 0xdbc   :  { %2615 = vmatprep.subr.mxu1 %v2996_v1 }
 0xe74   :  { %v653_v34 = vpop.f32.mrf.mxu1 }
 0xe75   :  { %v657_v35 = vadd.f32 %v653_v34, %v96_v0 }
 0xe76   :  { %v2573_v36 = vpop.f32.mrf.mxu1 }
 0xe77   :  { %2867 = vtanh.f32 %v657_v35 }
 0xe84   :  { %v2868_v37 = vpop.eup %2867 }
 0xe85   :  { %v659_v2 = vmul.f32 %v2868_v37, %v3072_v12 }
 0xe87   :  { %v660_v38 = vadd.f32 %v659_v2, %v3074_v14 }
 0xe89   :  { %663 = vrot.lane.b32.xlu0 %v660_v38, %s2999_s26  ;;  %v661_v4 = vmul.f32 %v660_v38, %v575_v29  ;;  %v3255_v29 = vld [vmem:[#allocation7 + $0x70] sm:$0xff] }
 0xefb   :  { %v664_v3 = vpop.permute.xlu0 %663 }
 0xefc   :  { %v666_v39 = vmul.f32 %v664_v3, %v660_v38 }
 0xefe   :  { %668 = vrot.lane.b32.xlu1 %v666_v39, %s3000_s27 }
 0xf70   :  { %v669_v40 = vpop.permute.xlu1 %668 }
 0xf71   :  { %v3180_v42 = vadd.f32 %v669_v40, %v661_v4 }
 0xf73   :  { %2869 = vtanh.f32 %v3180_v42 }
 0xf80   :  { %v2870_v43 = vpop.eup %2869 }
 0xf81   :  { %674 = vrot.lane.b32.xlu0 %v2870_v43, %s2999_s26 }
 0xff3   :  { %v675_v44 = vpop.permute.xlu0 %674 }
 0xff4   :  { %v677_v45 = vmul.f32 %v675_v44, %v660_v38 }
 0xff6   :  { %679 = vrot.lane.b32.xlu1 %v677_v45, %s3000_s27 }
0x1068   :  { %v3187_v47 = vpop.permute.xlu1 %679 }
0x1069   :  { %2583 = vmatmul.mubr.msk.f32.vlgmr.msra.gmra.mxu0 %vm103_vm4, %v3187_v47 }
0x106a   :  { %2597 = vmatpush3.msra.mxu0 %v3185_v46  ;;  %2612 = vmatprep.mubr.msk.f32.mxu0 %vm2997_vm0, %v2996_v1 }
0x106b   :  { %2598 = vmatprep.subr.mxu0 %v2996_v1 }
0x106c   :  { %2599 = vmatpush3.msra.mxu0 %v3191_v48 }
0x106d   :  { %2600 = vmatprep.subr.mxu0 %v2996_v1 }
0x106e   :  { %2601 = vmatpush3.msra.mxu0 %v3197_v49 }
0x106f   :  { %2602 = vmatprep.subr.mxu0 %v2996_v1 }
0x1070   :  { %2603 = vmatpush3.msra.mxu0 %v3201_v50 }
0x1071   :  { %2604 = vmatprep.subr.mxu0 %v2996_v1 }
0x1072   :  { %2605 = vmatpush3.msra.mxu0 %v3205_v51 }
0x1073   :  { %2606 = vmatprep.subr.mxu0 %v2996_v1 }
0x1074   :  { %2607 = vmatpush3.msra.mxu0 %v3209_v52 }
0x1075   :  { %2608 = vmatprep.subr.mxu0 %v2996_v1 }
0x1076   :  { %2609 = vmatpush3.msra.mxu0 %v3213_v53 }
0x1077   :  { %2610 = vmatprep.subr.mxu0 %v2996_v1 }
0x1078   :  { %2611 = vmatpush3.msra.mxu0 %v3217_v54 }
0x1079   :  { %2613 = vmatmul.mubr.msk.f32.vlgmr.msra.gmra.mxu0 %vm872_vm5, %v871_v55  ;;  %2645 = vmatprep.subr.mxu0 %v2996_v1 }
0x107a   :  { %2653 = vmatprep.mubr.msk.f32.mxu0 %vm2997_vm0, %v2996_v1  ;;  %2646 = vmatpush3.msra.mxu0 %v3248_v27 }
0x107b   :  { %2647 = vmatprep.subr.mxu0 %v2996_v1 }
0x107c   :  { %2648 = vmatpush3.msra.mxu0 %v3251_v28 }
0x107d   :  { %2649 = vmatprep.subr.mxu0 %v2996_v1 }
0x107e   :  { %2650 = vmatpush3.msra.mxu0 %v3255_v29 }
0x107f   :  { %2651 = vmatprep.subr.mxu0 %v2996_v1 }
0x1080   :  { %2652 = vmatpush3.msra.mxu0 %v3259_v30 }
0x1081   :  { %2656 = vmatprep.subr.mxu0 %v2996_v1 }
0x1129   :  { %v749_v58 = vpop.f32.mrf.mxu0 }
0x112a   :  { %v753_v59 = vadd.f32 %v749_v58, %v99_v56 }
0x112b   :  { %v2584_v60 = vpop.f32.mrf.mxu0 }
0x112c   :  { %2871 = vtanh.f32 %v753_v59 }
0x1139   :  { %v2872_v62 = vpop.eup %2871  ;;  %v942_v25 = vpop.f32.mrf.mxu0 }
0x113a   :  { %v943_v63 = vadd.f32 %v942_v25, %v3228_v61  ;;  %v755_v5 = vmul.f32 %v2872_v62, %v3072_v12 }
0x113b   :  { %v2614_v6 = vpop.f32.mrf.mxu0 }
0x113c   :  { %2873 = vtanh.f32 %v943_v63  ;;  %v756_v7 = vadd.f32 %v755_v5, %v3074_v14 }
0x113e   :  { %759 = vrot.lane.b32.xlu0 %v756_v7, %s2999_s26  ;;  %v757_v18 = vmul.f32 %v756_v7, %v3180_v42 }
0x1149   :  { %v2874_v8 = vpop.eup %2873 }
0x114a   :  { %v947_v9 = vmul.f32 %v2874_v8, %v3072_v12 }
0x114c   :  { %v948_v10 = vadd.f32 %v947_v9, %v3074_v14 }
0x114e   :  { %951 = vrot.lane.b32.xlu1 %v948_v10, %s2999_s26  ;;  %v949_v21 = vmul.f32 0.0, %v948_v10 }
0x11b0   :  { %v760_v11 = vpop.permute.xlu0 %759 }
0x11b1   :  { %v762_v13 = vmul.f32 %v760_v11, %v756_v7 }
0x11b3   :  { %764 = vrot.lane.b32.xlu0 %v762_v13, %s3000_s27 }
0x11c0   :  { %v952_v15 = vpop.permute.xlu1 %951 }
0x11c1   :  { %v954_v17 = vmul.f32 %v952_v15, %v948_v10 }
0x11c3   :  { %956 = vrot.lane.b32.xlu1 %v954_v17, %s3000_s27 }
0x1225   :  { %v765_v19 = vpop.permute.xlu0 %764 }
0x1226   :  { %v3240_v20 = vadd.f32 %v765_v19, %v757_v18 }
0x1228   :  { %2875 = vtanh.f32 %v3240_v20 }
0x1235   :  { %v2876_v22 = vpop.eup %2875  ;;  %v957_v23 = vpop.permute.xlu1 %956 }
0x1236   :  { %v3243_v24 = vadd.f32 %v957_v23, %v949_v21  ;;  %770 = vrot.lane.b32.xlu0 %v2876_v22, %s2999_s26 }
0x1238   :  { %2877 = vtanh.f32 %v3243_v24 }
0x1245   :  { %v2878_v26 = vpop.eup %2877 }
0x1246   :  { %962 = vrot.lane.b32.xlu1 %v2878_v26, %s2999_s26 }
0x12a8   :  { %v771_v31 = vpop.permute.xlu0 %770 }
0x12a9   :  { %v773_v32 = vmul.f32 %v771_v31, %v756_v7 }
0x12ab   :  { %775 = vrot.lane.b32.xlu0 %v773_v32, %s3000_s27 }
0x12b8   :  { %v963_v0 = vpop.permute.xlu1 %962 }
0x12b9   :  { %v965_v34 = vmul.f32 %v963_v0, %v948_v10 }
0x12bb   :  { %1042 = vrot.lane.b32.xlu0 %v965_v34, %s2999_s26  ;;  %967 = vrot.lane.b32.xlu1 %v965_v34, %s3000_s27 }
0x131d   :  { %v3267_v35 = vpop.permute.xlu0 %775 }
0x131e   :  { %2594 = vmatmul.mubr.msk.f32.vlgmr.msra.gmra.mxu1 %vm103_vm4, %v3267_v35 }
0x131f   :  { %2616 = vmatpush3.msra.mxu1 %v3248_v27  ;;  %2623 = vmatprep.mubr.msk.f32.mxu1 %vm2997_vm0, %v2996_v1 }
0x1320   :  { %2617 = vmatprep.subr.mxu1 %v2996_v1 }
0x1321   :  { %2618 = vmatpush3.msra.mxu1 %v3251_v28 }
0x1322   :  { %2619 = vmatprep.subr.mxu1 %v2996_v1 }
0x1323   :  { %2620 = vmatpush3.msra.mxu1 %v3255_v29 }
0x1324   :  { %2621 = vmatprep.subr.mxu1 %v2996_v1 }
0x1325   :  { %2622 = vmatpush3.msra.mxu1 %v3259_v30 }
0x1326   :  { %2626 = vmatprep.subr.mxu1 %v2996_v1 }
0x132d   :  { %v968_v36 = vpop.permute.xlu1 %967  ;;  %v1043_v37 = vpop.permute.xlu0 %1042 }
0x132e   :  { %2624 = vmatmul.mubr.msk.f32.vlgmr.msra.gmra.mxu1 %vm103_vm4, %v968_v36  ;;  %v1045_v2 = vsel %vm103_vm4, %v3102_v41, %v1043_v37 }
0x132f   :  { %2627 = vmatpush3.msra.mxu1 %v3185_v46  ;;  %2642 = vmatprep.mubr.msk.f32.mxu1 %vm2997_vm0, %v2996_v1 }
0x1330   :  { %2628 = vmatprep.subr.mxu1 %v2996_v1 }
0x1331   :  { %2629 = vmatpush3.msra.mxu1 %v3191_v48 }
0x1332   :  { %2630 = vmatprep.subr.mxu1 %v2996_v1 }
0x1333   :  { %2631 = vmatpush3.msra.mxu1 %v3197_v49 }
0x1334   :  { %2632 = vmatprep.subr.mxu1 %v2996_v1 }
0x1335   :  { %2633 = vmatpush3.msra.mxu1 %v3201_v50 }
0x1336   :  { %2634 = vmatprep.subr.mxu1 %v2996_v1 }
0x1337   :  { %2635 = vmatpush3.msra.mxu1 %v3205_v51 }
0x1338   :  { %2636 = vmatprep.subr.mxu1 %v2996_v1 }
0x1339   :  { %2637 = vmatpush3.msra.mxu1 %v3209_v52 }
0x133a   :  { %2638 = vmatprep.subr.mxu1 %v2996_v1 }
0x133b   :  { %2639 = vmatpush3.msra.mxu1 %v3213_v53 }
0x133c   :  { %2640 = vmatprep.subr.mxu1 %v2996_v1 }
0x133d   :  { %2641 = vmatpush3.msra.mxu1 %v3217_v54 }
0x133e   :  { %2643 = vmatmul.mubr.msk.f32.vlgmr.msra.gmra.mxu1 %vm872_vm5, %v1045_v2  ;;  %2675 = vmatprep.subr.mxu1 %v2996_v1 }
0x133f   :  { %2676 = vmatpush3.msra.mxu1 %v3248_v27  ;;  %2683 = vmatprep.mubr.msk.f32.mxu1 %vm2997_vm0, %v2996_v1 }
0x1340   :  { %2677 = vmatprep.subr.mxu1 %v2996_v1 }
0x1341   :  { %2678 = vmatpush3.msra.mxu1 %v3251_v28 }
0x1342   :  { %2679 = vmatprep.subr.mxu1 %v2996_v1 }
0x1343   :  { %2680 = vmatpush3.msra.mxu1 %v3255_v29 }
0x1344   :  { %2681 = vmatprep.subr.mxu1 %v2996_v1 }
0x1345   :  { %2682 = vmatpush3.msra.mxu1 %v3259_v30 }
0x1346   :  { %2686 = vmatprep.subr.mxu1 %v2996_v1 }
0x13de   :  { %v3313_v41 = vpop.f32.mrf.mxu1 }
0x13e0   :  { %v2595_v38 = vpop.f32.mrf.mxu1 }
0x13ee   :  { %v1037_v3 = vpop.f32.mrf.mxu1 }
0x13f0   :  { %v2625_v39 = vpop.f32.mrf.mxu1 }
0x13fe   :  { %v1115_v4 = vpop.f32.mrf.mxu1 }
0x13ff   :  { %v1116_v40 = vadd.f32 %v1115_v4, %v3228_v61 }
0x1400   :  { %v2644_v42 = vpop.f32.mrf.mxu1 }
0x1401   :  { %2879 = vtanh.f32 %v1116_v40 }
0x140e   :  { %v2880_v43 = vpop.eup %2879 }
0x140f   :  { %v1120_v44 = vmul.f32 %v2880_v43, %v3072_v12 }
0x1411   :  { %v1121_v45 = vadd.f32 %v1120_v44, %v3074_v14 }
0x1413   :  { %1124 = vrot.lane.b32.xlu1 %v1121_v45, %s2999_s26  ;;  %v1122_v58 = vmul.f32 %v1121_v45, %v3243_v24 }
0x1485   :  { %v1125_v55 = vpop.permute.xlu1 %1124 }
0x1486   :  { %v1127_v56 = vmul.f32 %v1125_v55, %v1121_v45 }
0x1488   :  { %1129 = vrot.lane.b32.xlu0 %v1127_v56, %s3000_s27 }
0x14fa   :  { %v1130_v59 = vpop.permute.xlu0 %1129 }
0x14fb   :  { %v1132_v60 = vadd.f32 %v1130_v59, %v1122_v58 }
0x14fd   :  { %2881 = vtanh.f32 %v1132_v60 }
0x150a   :  { %v2882_v62 = vpop.eup %2881 }
0x150b   :  { %1135 = vrot.lane.b32.xlu1 %v2882_v62, %s2999_s26 }
0x157d   :  { %v1136_v25 = vpop.permute.xlu1 %1135 }
0x157e   :  { %v1138_v63 = vmul.f32 %v1136_v25, %v1121_v45 }
0x1580   :  { %1215 = vrot.lane.b32.xlu1 %v1138_v63, %s2999_s26  ;;  %1140 = vrot.lane.b32.xlu0 %v1138_v63, %s3000_s27 }
0x15f2   :  { %v1141_v5 = vpop.permute.xlu0 %1140  ;;  %v1216_v6 = vpop.permute.xlu1 %1215 }
0x15f3   :  { %2654 = vmatmul.mubr.msk.f32.vlgmr.msra.gmra.mxu0 %vm103_vm4, %v1141_v5  ;;  %v1218_v7 = vsel %vm103_vm4, %v3122_v57, %v1216_v6  ;;  %v3356_v57 = vld [vmem:[#allocation7 + $0x88] sm:$0x1] }
0x15f4   :  { %2657 = vmatpush3.msra.mxu0 %v3185_v46  ;;  %2672 = vmatprep.mubr.msk.f32.mxu0 %vm2997_vm0, %v2996_v1  ;;  %v1038_v11 = vadd.f32 %v1037_v3, %v3356_v57 }
0x15f5   :  { %2658 = vmatprep.subr.mxu0 %v2996_v1 }
0x15f6   :  { %2659 = vmatpush3.msra.mxu0 %v3191_v48 }
0x15f7   :  { %2660 = vmatprep.subr.mxu0 %v2996_v1 }
0x15f8   :  { %2661 = vmatpush3.msra.mxu0 %v3197_v49 }
0x15f9   :  { %2662 = vmatprep.subr.mxu0 %v2996_v1 }
0x15fa   :  { %2663 = vmatpush3.msra.mxu0 %v3201_v50 }
0x15fb   :  { %2664 = vmatprep.subr.mxu0 %v2996_v1 }
0x15fc   :  { %2665 = vmatpush3.msra.mxu0 %v3205_v51 }
0x15fd   :  { %2666 = vmatprep.subr.mxu0 %v2996_v1 }
0x15fe   :  { %2667 = vmatpush3.msra.mxu0 %v3209_v52 }
0x15ff   :  { %2668 = vmatprep.subr.mxu0 %v2996_v1 }
0x1600   :  { %2669 = vmatpush3.msra.mxu0 %v3213_v53 }
0x1601   :  { %2670 = vmatprep.subr.mxu0 %v2996_v1 }
0x1602   :  { %2671 = vmatpush3.msra.mxu0 %v3217_v54 }
0x1603   :  { %2673 = vmatmul.mubr.msk.f32.vlgmr.msra.gmra.mxu0 %vm872_vm5, %v1218_v7  ;;  %2705 = vmatprep.subr.mxu0 %v2996_v1 }
0x1604   :  { %2706 = vmatpush3.msra.mxu0 %v3248_v27  ;;  %2713 = vmatprep.mubr.msk.f32.mxu0 %vm2997_vm0, %v2996_v1 }
0x1605   :  { %2707 = vmatprep.subr.mxu0 %v2996_v1 }
0x1606   :  { %2708 = vmatpush3.msra.mxu0 %v3251_v28 }
0x1607   :  { %2709 = vmatprep.subr.mxu0 %v2996_v1 }
0x1608   :  { %2710 = vmatpush3.msra.mxu0 %v3255_v29 }
0x1609   :  { %2711 = vmatprep.subr.mxu0 %v2996_v1 }
0x160a   :  { %2712 = vmatpush3.msra.mxu0 %v3259_v30 }
0x160b   :  { %2716 = vmatprep.subr.mxu0 %v2996_v1 }
0x16b3   :  { %v1210_v8 = vpop.f32.mrf.mxu0 }
0x16b4   :  { %v1211_v9 = vadd.f32 %v1210_v8, %v3356_v57 }
0x16b5   :  { %v2655_v10 = vpop.f32.mrf.mxu0 }
0x16b6   :  { %v2256_v13 = vrot.slane %v1211_v9, 7 }
0x16b8   :  { %v2277_v15 = vsel %vm2276_vm6, %v1038_v11, %v2256_v13 }
0x16c3   :  { %v1288_v17 = vpop.f32.mrf.mxu0 }
0x16c4   :  { %v1289_v18 = vadd.f32 %v1288_v17, %v3228_v61 }
0x16c5   :  { %v2674_v19 = vpop.f32.mrf.mxu0 }
0x16c6   :  { %2883 = vtanh.f32 %v1289_v18 }
0x16d3   :  { %v2884_v21 = vpop.eup %2883 }
0x16d4   :  { %v1293_v22 = vmul.f32 %v2884_v21, %v3072_v12 }
0x16d6   :  { %v1294_v23 = vadd.f32 %v1293_v22, %v3074_v14 }
0x16d8   :  { %1297 = vrot.lane.b32.xlu0 %v1294_v23, %s2999_s26  ;;  %v1295_v31 = vmul.f32 %v1294_v23, %v1132_v60 }
0x174a   :  { %v1298_v24 = vpop.permute.xlu0 %1297 }
0x174b   :  { %v1300_v26 = vmul.f32 %v1298_v24, %v1294_v23 }
0x174d   :  { %1302 = vrot.lane.b32.xlu1 %v1300_v26, %s3000_s27 }
0x17bf   :  { %v1303_v32 = vpop.permute.xlu1 %1302 }
0x17c0   :  { %v1305_v0 = vadd.f32 %v1303_v32, %v1295_v31 }
0x17c2   :  { %2885 = vtanh.f32 %v1305_v0 }
0x17cf   :  { %v2886_v34 = vpop.eup %2885 }
0x17d0   :  { %1308 = vrot.lane.b32.xlu0 %v2886_v34, %s2999_s26 }
0x1842   :  { %v1309_v36 = vpop.permute.xlu0 %1308 }
0x1843   :  { %v1311_v37 = vmul.f32 %v1309_v36, %v1294_v23 }
0x1845   :  { %1388 = vrot.lane.b32.xlu0 %v1311_v37, %s2999_s26  ;;  %1313 = vrot.lane.b32.xlu1 %v1311_v37, %s3000_s27 }
0x18b7   :  { %v1314_v2 = vpop.permute.xlu1 %1313  ;;  %v1389_v38 = vpop.permute.xlu0 %1388 }
0x18b8   :  { %2684 = vmatmul.mubr.msk.f32.vlgmr.msra.gmra.mxu1 %vm103_vm4, %v1314_v2  ;;  %v1391_v3 = vsel %vm103_vm4, %v3142_v16, %v1389_v38 }
0x18b9   :  { %2687 = vmatpush3.msra.mxu1 %v3185_v46  ;;  %2702 = vmatprep.mubr.msk.f32.mxu1 %vm2997_vm0, %v2996_v1 }
0x18ba   :  { %2688 = vmatprep.subr.mxu1 %v2996_v1 }
0x18bb   :  { %2689 = vmatpush3.msra.mxu1 %v3191_v48 }
0x18bc   :  { %2690 = vmatprep.subr.mxu1 %v2996_v1 }
0x18bd   :  { %2691 = vmatpush3.msra.mxu1 %v3197_v49 }
0x18be   :  { %2692 = vmatprep.subr.mxu1 %v2996_v1 }
0x18bf   :  { %2693 = vmatpush3.msra.mxu1 %v3201_v50 }
0x18c0   :  { %2694 = vmatprep.subr.mxu1 %v2996_v1 }
0x18c1   :  { %2695 = vmatpush3.msra.mxu1 %v3205_v51 }
0x18c2   :  { %2696 = vmatprep.subr.mxu1 %v2996_v1 }
0x18c3   :  { %2697 = vmatpush3.msra.mxu1 %v3209_v52 }
0x18c4   :  { %2698 = vmatprep.subr.mxu1 %v2996_v1 }
0x18c5   :  { %2699 = vmatpush3.msra.mxu1 %v3213_v53 }
0x18c6   :  { %2700 = vmatprep.subr.mxu1 %v2996_v1 }
0x18c7   :  { %2701 = vmatpush3.msra.mxu1 %v3217_v54 }
0x18c8   :  { %2703 = vmatmul.mubr.msk.f32.vlgmr.msra.gmra.mxu1 %vm872_vm5, %v1391_v3  ;;  %2735 = vmatprep.subr.mxu1 %v2996_v1 }
0x18c9   :  { %2736 = vmatpush3.msra.mxu1 %v3248_v27  ;;  %2743 = vmatprep.mubr.msk.f32.mxu1 %vm2997_vm0, %v2996_v1 }
0x18ca   :  { %2737 = vmatprep.subr.mxu1 %v2996_v1 }
0x18cb   :  { %2738 = vmatpush3.msra.mxu1 %v3251_v28 }
0x18cc   :  { %2739 = vmatprep.subr.mxu1 %v2996_v1 }
0x18cd   :  { %2740 = vmatpush3.msra.mxu1 %v3255_v29 }
0x18ce   :  { %2741 = vmatprep.subr.mxu1 %v2996_v1 }
0x18cf   :  { %2742 = vmatpush3.msra.mxu1 %v3259_v30 }
0x18d0   :  { %2746 = vmatprep.subr.mxu1 %v2996_v1 }
0x1978   :  { %v1383_v16 = vpop.f32.mrf.mxu1 }
0x1979   :  { %v1384_v39 = vadd.f32 %v1383_v16, %v3356_v57 }
0x197a   :  { %v2685_v4 = vpop.f32.mrf.mxu1 }
0x197b   :  { %v2259_v40 = vrot.slane %v1384_v39, 6 }
0x197d   :  { %v2279_v42 = vsel %vm2278_vm7, %v2277_v15, %v2259_v40 }
0x1988   :  { %v1461_v43 = vpop.f32.mrf.mxu1 }
0x1989   :  { %v1462_v44 = vadd.f32 %v1461_v43, %v3228_v61 }
0x198a   :  { %v2704_v45 = vpop.f32.mrf.mxu1 }
0x198b   :  { %2887 = vtanh.f32 %v1462_v44 }
0x1998   :  { %v2888_v55 = vpop.eup %2887 }
0x1999   :  { %v1466_v56 = vmul.f32 %v2888_v55, %v3072_v12 }
0x199b   :  { %v1467_v58 = vadd.f32 %v1466_v56, %v3074_v14 }
0x199d   :  { %1470 = vrot.lane.b32.xlu1 %v1467_v58, %s2999_s26  ;;  %v1468_v62 = vmul.f32 %v1467_v58, %v1305_v0 }
0x1a0f   :  { %v1471_v59 = vpop.permute.xlu1 %1470 }
0x1a10   :  { %v1473_v60 = vmul.f32 %v1471_v59, %v1467_v58 }
0x1a12   :  { %1475 = vrot.lane.b32.xlu0 %v1473_v60, %s3000_s27 }
0x1a84   :  { %v1476_v25 = vpop.permute.xlu0 %1475 }
0x1a85   :  { %v1478_v63 = vadd.f32 %v1476_v25, %v1468_v62 }
0x1a87   :  { %2889 = vtanh.f32 %v1478_v63 }
0x1a94   :  { %v2890_v5 = vpop.eup %2889 }
0x1a95   :  { %1481 = vrot.lane.b32.xlu1 %v2890_v5, %s2999_s26 }
0x1b07   :  { %v1482_v6 = vpop.permute.xlu1 %1481 }
0x1b08   :  { %v1484_v7 = vmul.f32 %v1482_v6, %v1467_v58  ;;  %v102_v6 = vld [vmem:[%s101_s14] sm:$0x1] }
0x1b0a   :  { %1561 = vrot.lane.b32.xlu1 %v1484_v7, %s2999_s26  ;;  %1486 = vrot.lane.b32.xlu0 %v1484_v7, %s3000_s27  ;;  %v849_v7 = vadd.f32 %v3313_v41, %v102_v6 }
0x1b7c   :  { %v1487_v8 = vpop.permute.xlu0 %1486  ;;  %v1562_v9 = vpop.permute.xlu1 %1561 }
0x1b7d   :  { %2714 = vmatmul.mubr.msk.f32.vlgmr.msra.gmra.mxu0 %vm103_vm4, %v1487_v8  ;;  %v1564_v10 = vsel %vm103_vm4, %v3162_v33, %v1562_v9 }
0x1b7e   :  { %2717 = vmatpush3.msra.mxu0 %v3185_v46  ;;  %2732 = vmatprep.mubr.msk.f32.mxu0 %vm2997_vm0, %v2996_v1 }
0x1b7f   :  { %2718 = vmatprep.subr.mxu0 %v2996_v1 }
0x1b80   :  { %2719 = vmatpush3.msra.mxu0 %v3191_v48 }
0x1b81   :  { %2720 = vmatprep.subr.mxu0 %v2996_v1 }
0x1b82   :  { %2721 = vmatpush3.msra.mxu0 %v3197_v49 }
0x1b83   :  { %2722 = vmatprep.subr.mxu0 %v2996_v1 }
0x1b84   :  { %2723 = vmatpush3.msra.mxu0 %v3201_v50 }
0x1b85   :  { %2724 = vmatprep.subr.mxu0 %v2996_v1 }
0x1b86   :  { %2725 = vmatpush3.msra.mxu0 %v3205_v51 }
0x1b87   :  { %2726 = vmatprep.subr.mxu0 %v2996_v1 }
0x1b88   :  { %2727 = vmatpush3.msra.mxu0 %v3209_v52 }
0x1b89   :  { %2728 = vmatprep.subr.mxu0 %v2996_v1 }
0x1b8a   :  { %2729 = vmatpush3.msra.mxu0 %v3213_v53 }
0x1b8b   :  { %2730 = vmatprep.subr.mxu0 %v2996_v1 }
0x1b8c   :  { %2731 = vmatpush3.msra.mxu0 %v3217_v54 }
0x1b8d   :  { %2733 = vmatmul.mubr.msk.f32.vlgmr.msra.gmra.mxu0 %vm872_vm5, %v1564_v10  ;;  %2765 = vmatprep.subr.mxu0 %v2996_v1 }
0x1b8e   :  { %2766 = vmatpush3.msra.mxu0 %v3248_v27  ;;  %2773 = vmatprep.mubr.msk.f32.mxu0 %vm2997_vm0, %v2996_v1 }
0x1b8f   :  { %2767 = vmatprep.subr.mxu0 %v2996_v1 }
0x1b90   :  { %2768 = vmatpush3.msra.mxu0 %v3251_v28 }
0x1b91   :  { %2769 = vmatprep.subr.mxu0 %v2996_v1 }
0x1b92   :  { %2770 = vmatpush3.msra.mxu0 %v3255_v29 }
0x1b93   :  { %2771 = vmatprep.subr.mxu0 %v2996_v1 }
0x1b94   :  { %2772 = vmatpush3.msra.mxu0 %v3259_v30 }
0x1b95   :  { %2776 = vmatprep.subr.mxu0 %v2996_v1 }
0x1c3d   :  { %v1556_v33 = vpop.f32.mrf.mxu0 }
0x1c3e   :  { %v1557_v11 = vadd.f32 %v1556_v33, %v3356_v57 }
0x1c3f   :  { %v2715_v13 = vpop.f32.mrf.mxu0 }
0x1c40   :  { %v2262_v15 = vrot.slane %v1557_v11, 5 }
0x1c42   :  { %v2281_v17 = vsel %vm2280_vm8, %v2279_v42, %v2262_v15 }
0x1c4d   :  { %v1634_v18 = vpop.f32.mrf.mxu0 }
0x1c4e   :  { %v1635_v19 = vadd.f32 %v1634_v18, %v3228_v61 }
0x1c4f   :  { %v2734_v21 = vpop.f32.mrf.mxu0 }
0x1c50   :  { %2891 = vtanh.f32 %v1635_v19 }
0x1c5d   :  { %v2892_v22 = vpop.eup %2891 }
0x1c5e   :  { %v1639_v23 = vmul.f32 %v2892_v22, %v3072_v12 }
0x1c60   :  { %v1640_v24 = vadd.f32 %v1639_v23, %v3074_v14 }
0x1c62   :  { %1643 = vrot.lane.b32.xlu0 %v1640_v24, %s2999_s26  ;;  %v1641_v32 = vmul.f32 %v1640_v24, %v1478_v63 }
0x1cd4   :  { %v1644_v26 = vpop.permute.xlu0 %1643 }
0x1cd5   :  { %v1646_v31 = vmul.f32 %v1644_v26, %v1640_v24 }
0x1cd7   :  { %1648 = vrot.lane.b32.xlu1 %v1646_v31, %s3000_s27 }
0x1d49   :  { %v1649_v0 = vpop.permute.xlu1 %1648 }
0x1d4a   :  { %v1651_v34 = vadd.f32 %v1649_v0, %v1641_v32 }
0x1d4c   :  { %2893 = vtanh.f32 %v1651_v34 }
0x1d59   :  { %v2894_v36 = vpop.eup %2893 }
0x1d5a   :  { %1654 = vrot.lane.b32.xlu0 %v2894_v36, %s2999_s26 }
0x1dcc   :  { %v1655_v37 = vpop.permute.xlu0 %1654 }
0x1dcd   :  { %v1657_v2 = vmul.f32 %v1655_v37, %v1640_v24 }
0x1dcf   :  { %1734 = vrot.lane.b32.xlu0 %v1657_v2, %s2999_s26  ;;  %1659 = vrot.lane.b32.xlu1 %v1657_v2, %s3000_s27 }
0x1e41   :  { %v1660_v38 = vpop.permute.xlu1 %1659  ;;  %v1735_v3 = vpop.permute.xlu0 %1734 }
0x1e42   :  { %2744 = vmatmul.mubr.msk.f32.vlgmr.msra.gmra.mxu1 %vm103_vm4, %v1660_v38  ;;  %v1737_v16 = vsel %vm103_vm4, %v3187_v47, %v1735_v3 }
0x1e43   :  { %2747 = vmatpush3.msra.mxu1 %v3185_v46  ;;  %2762 = vmatprep.mubr.msk.f32.mxu1 %vm2997_vm0, %v2996_v1 }
0x1e44   :  { %2748 = vmatprep.subr.mxu1 %v2996_v1 }
0x1e45   :  { %2749 = vmatpush3.msra.mxu1 %v3191_v48 }
0x1e46   :  { %2750 = vmatprep.subr.mxu1 %v2996_v1 }
0x1e47   :  { %2751 = vmatpush3.msra.mxu1 %v3197_v49 }
0x1e48   :  { %2752 = vmatprep.subr.mxu1 %v2996_v1 }
0x1e49   :  { %2753 = vmatpush3.msra.mxu1 %v3201_v50 }
0x1e4a   :  { %2754 = vmatprep.subr.mxu1 %v2996_v1 }
0x1e4b   :  { %2755 = vmatpush3.msra.mxu1 %v3205_v51 }
0x1e4c   :  { %2756 = vmatprep.subr.mxu1 %v2996_v1 }
0x1e4d   :  { %2757 = vmatpush3.msra.mxu1 %v3209_v52 }
0x1e4e   :  { %2758 = vmatprep.subr.mxu1 %v2996_v1 }
0x1e4f   :  { %2759 = vmatpush3.msra.mxu1 %v3213_v53 }
0x1e50   :  { %2760 = vmatprep.subr.mxu1 %v2996_v1 }
0x1e51   :  { %2761 = vmatpush3.msra.mxu1 %v3217_v54 }
0x1e52   :  { %2763 = vmatmul.mubr.msk.f32.vlgmr.msra.gmra.mxu1 %vm872_vm5, %v1737_v16  ;;  %2795 = vmatprep.subr.mxu1 %v2996_v1 }
0x1e53   :  { %2796 = vmatpush3.msra.mxu1 %v3248_v27  ;;  %2803 = vmatprep.mubr.msk.f32.mxu1 %vm2997_vm0, %v2996_v1 }
0x1e54   :  { %2797 = vmatprep.subr.mxu1 %v2996_v1 }
0x1e55   :  { %2798 = vmatpush3.msra.mxu1 %v3251_v28 }
0x1e56   :  { %2799 = vmatprep.subr.mxu1 %v2996_v1 }
0x1e57   :  { %2800 = vmatpush3.msra.mxu1 %v3255_v29 }
0x1e58   :  { %2801 = vmatprep.subr.mxu1 %v2996_v1 }
0x1e59   :  { %2802 = vmatpush3.msra.mxu1 %v3259_v30 }
0x1e5a   :  { %2806 = vmatprep.subr.mxu1 %v2996_v1 }
0x1f02   :  { %v1729_v47 = vpop.f32.mrf.mxu1 }
0x1f03   :  { %v1730_v39 = vadd.f32 %v1729_v47, %v3356_v57 }
0x1f04   :  { %v2745_v4 = vpop.f32.mrf.mxu1 }
0x1f05   :  { %v2265_v40 = vrot.slane %v1730_v39, 4 }
0x1f07   :  { %v3483_v42 = vsel %vm2282_vm9, %v2281_v17, %v2265_v40 }
0x1f12   :  { %v1807_v43 = vpop.f32.mrf.mxu1 }
0x1f13   :  { %v1808_v44 = vadd.f32 %v1807_v43, %v3228_v61 }
0x1f14   :  { %v2764_v45 = vpop.f32.mrf.mxu1 }
0x1f15   :  { %2895 = vtanh.f32 %v1808_v44 }
0x1f22   :  { %v2896_v55 = vpop.eup %2895 }
0x1f23   :  { %v1812_v56 = vmul.f32 %v2896_v55, %v3072_v12 }
0x1f25   :  { %v1813_v58 = vadd.f32 %v1812_v56, %v3074_v14 }
0x1f27   :  { %1816 = vrot.lane.b32.xlu1 %v1813_v58, %s2999_s26  ;;  %v1814_v62 = vmul.f32 %v1813_v58, %v1651_v34 }
0x1f99   :  { %v1817_v59 = vpop.permute.xlu1 %1816 }
0x1f9a   :  { %v1819_v60 = vmul.f32 %v1817_v59, %v1813_v58 }
0x1f9c   :  { %1821 = vrot.lane.b32.xlu0 %v1819_v60, %s3000_s27 }
0x200e   :  { %v1822_v25 = vpop.permute.xlu0 %1821 }
0x200f   :  { %v3490_v63 = vadd.f32 %v1822_v25, %v1814_v62 }
0x2011   :  { %2897 = vtanh.f32 %v3490_v63 }
0x2012   :  { %2899 = vtanh.f32 %v849_v7 }
0x201e   :  { %v2898_v5 = vpop.eup %2897 }
0x201f   :  { %1827 = vrot.lane.b32.xlu1 %v2898_v5, %s2999_s26  ;;  %v2900_v8 = vpop.eup %2899 }
0x2020   :  { %v851_v33 = vmul.f32 %v2900_v8, %v3072_v12 }
0x2022   :  { %v852_v11 = vadd.f32 %v851_v33, %v3074_v14 }
0x2091   :  { %v1828_v9 = vpop.permute.xlu1 %1827 }
0x2092   :  { %v1830_v10 = vmul.f32 %v1828_v9, %v1813_v58 }
0x2094   :  { %1907 = vrot.lane.b32.xlu1 %v1830_v10, %s2999_s26  ;;  %1832 = vrot.lane.b32.xlu0 %v1830_v10, %s3000_s27 }
0x2098   :  { %855 = vrot.lane.b32.xlu1 %v852_v11, %s2999_s26 }
0x2106   :  { %v1908_v13 = vpop.permute.xlu1 %1907  ;;  %v1833_v15 = vpop.permute.xlu0 %1832 }
0x2107   :  { %2774 = vmatmul.mubr.msk.f32.vlgmr.msra.gmra.mxu0 %vm103_vm4, %v1833_v15  ;;  %v1910_v18 = vsel %vm103_vm4, %v3267_v35, %v1908_v13  ;;  %v853_v35 = vmul.f32 %v852_v11, %v3240_v20 }
0x2108   :  { %2777 = vmatpush3.msra.mxu0 %v3185_v46  ;;  %2792 = vmatprep.mubr.msk.f32.mxu0 %vm2997_vm0, %v2996_v1 }
0x2109   :  { %2778 = vmatprep.subr.mxu0 %v2996_v1 }
0x210a   :  { %2779 = vmatpush3.msra.mxu0 %v3191_v48  ;;  %v856_v41 = vpop.permute.xlu1 %855 }
0x210b   :  { %v858_v17 = vmul.f32 %v856_v41, %v852_v11  ;;  %2780 = vmatprep.subr.mxu0 %v2996_v1 }
0x210c   :  { %2781 = vmatpush3.msra.mxu0 %v3197_v49 }
0x210d   :  { %2782 = vmatprep.subr.mxu0 %v2996_v1  ;;  %860 = vrot.lane.b32.xlu1 %v858_v17, %s3000_s27 }
0x210e   :  { %2783 = vmatpush3.msra.mxu0 %v3201_v50 }
0x210f   :  { %2784 = vmatprep.subr.mxu0 %v2996_v1 }
0x2110   :  { %2785 = vmatpush3.msra.mxu0 %v3205_v51 }
0x2111   :  { %2786 = vmatprep.subr.mxu0 %v2996_v1 }
0x2112   :  { %2787 = vmatpush3.msra.mxu0 %v3209_v52 }
0x2113   :  { %2788 = vmatprep.subr.mxu0 %v2996_v1 }
0x2114   :  { %2789 = vmatpush3.msra.mxu0 %v3213_v53 }
0x2115   :  { %2790 = vmatprep.subr.mxu0 %v2996_v1 }
0x2116   :  { %2791 = vmatpush3.msra.mxu0 %v3217_v54 }
0x2117   :  { %2793 = vmatmul.mubr.msk.f32.vlgmr.msra.gmra.mxu0 %vm872_vm5, %v1910_v18  ;;  %2825 = vmatprep.subr.mxu0 %v2996_v1 }
0x2118   :  { %2826 = vmatpush3.msra.mxu0 %v3248_v27  ;;  %2833 = vmatprep.mubr.msk.f32.mxu0 %vm2997_vm0, %v2996_v1 }
0x2119   :  { %2827 = vmatprep.subr.mxu0 %v2996_v1 }
0x211a   :  { %2828 = vmatpush3.msra.mxu0 %v3251_v28 }
0x211b   :  { %2829 = vmatprep.subr.mxu0 %v2996_v1 }
0x211c   :  { %2830 = vmatpush3.msra.mxu0 %v3255_v29 }
0x211d   :  { %2831 = vmatprep.subr.mxu0 %v2996_v1 }
0x211e   :  { %2832 = vmatpush3.msra.mxu0 %v3259_v30 }
0x217f   :  { %v861_v19 = vpop.permute.xlu1 %860 }
0x2180   :  { %v863_v21 = vadd.f32 %v861_v19, %v853_v35 }
0x2182   :  { %2901 = vtanh.f32 %v863_v21 }
0x218f   :  { %v2902_v27 = vpop.eup %2901 }
0x2190   :  { %866 = vrot.lane.b32.xlu1 %v2902_v27, %s2999_s26 }
0x21c7   :  { %v1902_v22 = vpop.f32.mrf.mxu0 }
0x21c8   :  { %v1903_v23 = vadd.f32 %v1902_v22, %v3356_v57 }
0x21c9   :  { %v2775_v28 = vpop.f32.mrf.mxu0 }
0x21ca   :  { %v2268_v24 = vrot.slane %v1903_v23, 3 }
0x21cc   :  { %v2285_v29 = vsel %vm2284_vm10, %v3483_v42, %v2268_v24 }
0x21d7   :  { %v1980_v26 = vpop.f32.mrf.mxu0 }
0x21d8   :  { %v1981_v31 = vadd.f32 %v1980_v26, %v3228_v61 }
0x21d9   :  { %v2794_v30 = vpop.f32.mrf.mxu0 }
0x21da   :  { %2903 = vtanh.f32 %v1981_v31 }
0x21e7   :  { %v2904_v20 = vpop.eup %2903 }
0x21e8   :  { %v1985_v32 = vmul.f32 %v2904_v20, %v3072_v12 }
0x21ea   :  { %v1986_v0 = vadd.f32 %v1985_v32, %v3074_v14 }
0x21ec   :  { %1989 = vrot.lane.b32.xlu0 %v1986_v0, %s2999_s26  ;;  %v1987_v38 = vmul.f32 %v1986_v0, %v3490_v63 }
0x2202   :  { %v867_v34 = vpop.permute.xlu1 %866 }
0x2203   :  { %v869_v36 = vmul.f32 %v867_v34, %v852_v11 }
0x2205   :  { %2080 = vrot.lane.b32.xlu1 %v869_v36, %s3000_s27 }
0x225e   :  { %v1990_v37 = vpop.permute.xlu0 %1989 }
0x225f   :  { %v1992_v2 = vmul.f32 %v1990_v37, %v1986_v0 }
0x2261   :  { %1994 = vrot.lane.b32.xlu0 %v1992_v2, %s3000_s27 }
0x22d3   :  { %v1995_v3 = vpop.permute.xlu0 %1994 }
0x22d4   :  { %v1997_v16 = vadd.f32 %v1995_v3, %v1987_v38 }
0x22d6   :  { %2905 = vtanh.f32 %v1997_v16 }
0x22e3   :  { %v2906_v47 = vpop.eup %2905 }
0x22e4   :  { %2000 = vrot.lane.b32.xlu0 %v2906_v47, %s2999_s26 }
0x2356   :  { %v2001_v39 = vpop.permute.xlu0 %2000 }
0x2357   :  { %v2003_v4 = vmul.f32 %v2001_v39, %v1986_v0 }
0x2359   :  { %2005 = vrot.lane.b32.xlu0 %v2003_v4, %s3000_s27 }
0x235d   :  { %2083 = vrot.lane.b32.xlu0 %v2003_v4, %s2999_s26 }
0x23cb   :  { %v2006_v40 = vpop.permute.xlu0 %2005 }
0x23cc   :  { %2804 = vmatmul.mubr.msk.f32.vlgmr.msra.gmra.mxu1 %vm103_vm4, %v2006_v40 }
0x23cd   :  { %2807 = vmatpush3.msra.mxu1 %v3185_v46  ;;  %2822 = vmatprep.mubr.msk.f32.mxu1 %vm2997_vm0, %v2996_v1 }
0x23ce   :  { %2808 = vmatprep.subr.mxu1 %v2996_v1 }
0x23cf   :  { %2809 = vmatpush3.msra.mxu1 %v3191_v48  ;;  %v2084_v46 = vpop.permute.xlu0 %2083  ;;  %v2081_v48 = vpop.permute.xlu1 %2080 }
0x23d0   :  { %2810 = vmatprep.subr.mxu1 %v2996_v1 }
0x23d1   :  { %2811 = vmatpush3.msra.mxu1 %v3197_v49  ;;  %v2086_v49 = vsel %vm103_vm4, %v2081_v48, %v2084_v46 }
0x23d2   :  { %2812 = vmatprep.subr.mxu1 %v2996_v1 }
0x23d3   :  { %2813 = vmatpush3.msra.mxu1 %v3201_v50 }
0x23d4   :  { %2814 = vmatprep.subr.mxu1 %v2996_v1 }
0x23d5   :  { %2815 = vmatpush3.msra.mxu1 %v3205_v51 }
0x23d6   :  { %2816 = vmatprep.subr.mxu1 %v2996_v1 }
0x23d7   :  { %2817 = vmatpush3.msra.mxu1 %v3209_v52 }
0x23d8   :  { %2818 = vmatprep.subr.mxu1 %v2996_v1 }
0x23d9   :  { %2819 = vmatpush3.msra.mxu1 %v3213_v53 }
0x23da   :  { %2820 = vmatprep.subr.mxu1 %v2996_v1 }
0x23db   :  { %2821 = vmatpush3.msra.mxu1 %v3217_v54 }
0x23dc   :  { %2823 = vmatmul.mubr.msk.f32.vlgmr.msra.gmra.mxu1 %vm872_vm5, %v2086_v49 }
0x248c   :  { %v2075_v50 = vpop.f32.mrf.mxu1 }
0x248d   :  { %v2076_v51 = vadd.f32 %v2075_v50, %v3356_v57 }
0x248e   :  { %v2805_v42 = vpop.f32.mrf.mxu1 }
0x248f   :  { %v2271_v52 = vrot.slane %v2076_v51, 2 }
0x2491   :  { %v2287_v43 = vsel %vm2286_vm11, %v2285_v29, %v2271_v52 }
0x249c   :  { %v2156_v44 = vpop.f32.mrf.mxu1 }
0x249d   :  { %v2157_v45 = vadd.f32 %v2156_v44, %v3228_v61 }
0x249e   :  { %v2824_v53 = vpop.f32.mrf.mxu1 }
0x249f   :  { %2907 = vtanh.f32 %v2157_v45 }
0x24ac   :  { %v2908_v55 = vpop.eup %2907 }
0x24ad   :  { %v2161_v1 = vmul.f32 %v2908_v55, %v3072_v12 }
0x24af   :  { %v2162_v56 = vadd.f32 %v2161_v1, %v3074_v14 }
0x24b1   :  { %2165 = vrot.lane.b32.xlu1 %v2162_v56, %s2999_s26  ;;  %v2163_v59 = vmul.f32 %v2162_v56, %v1997_v16 }
0x2523   :  { %v2166_v54 = vpop.permute.xlu1 %2165 }
0x2524   :  { %v2168_v58 = vmul.f32 %v2166_v54, %v2162_v56 }
0x2526   :  { %2170 = vrot.lane.b32.xlu0 %v2168_v58, %s3000_s27 }
0x2598   :  { %v2171_v60 = vpop.permute.xlu0 %2170 }
0x2599   :  { %v2173_v62 = vadd.f32 %v2171_v60, %v2163_v59 }
0x259b   :  { %2909 = vtanh.f32 %v2173_v62 }
0x25a8   :  { %v2910_v25 = vpop.eup %2909 }
0x25a9   :  { %2176 = vrot.lane.b32.xlu1 %v2910_v25, %s2999_s26 }
0x261b   :  { %v2177_v61 = vpop.permute.xlu1 %2176 }
0x261c   :  { %v2179_v63 = vmul.f32 %v2177_v61, %v2162_v56 }
0x261e   :  { %2181 = vrot.lane.b32.xlu0 %v2179_v63, %s3000_s27 }
0x2690   :  { %v2182_v12 = vpop.permute.xlu0 %2181 }
0x2691   :  { %2834 = vmatmul.mubr.msk.f32.vlgmr.msra.gmra.mxu0 %vm103_vm4, %v2182_v12 }
0x2751   :  { %v2251_v14 = vpop.f32.mrf.mxu0 }
0x2752   :  { %v2252_v5 = vadd.f32 %v2251_v14, %v3356_v57 }
0x2753   :  { %v2835_v6 = vpop.f32.mrf.mxu0 }
0x2754   :  { %v2274_v7 = vrot.slane %v2252_v5, 1 }
0x2756   :  { %v2289_v8 = vsel %vm2288_vm12, %v2287_v43, %v2274_v7 }
0x2757   :  { %2290 = vmax.xlane.f32.xlu1 %v2289_v8 }
0x27e0   :  { %v2291_v9 = vpop.xlane.xlu1 %2290 }
0x27e1   :  { %v2292_v10 = vsub.f32 %v2289_v8, %v2291_v9 }
0x27e3   :  { %v2293_v33 = vmul.f32 1.442695, %v2292_v10 }
0x27e5   :  { %2911 = vpow2.f32 %v2293_v33 }
0x27f2   :  { %v2912_v11 = vpop.eup %2911 }
0x27f3   :  { %2295 = vadd.xlane.f32.xlu0 %v2912_v11 }
0x287c   :  { %v2296_v13 = vpop.xlane.xlu0 %2295 }
0x287d   :  { %2913 = vlog2.f32 %v2296_v13 }
0x288a   :  { %v2914_v15 = vpop.eup %2913 }
0x288b   :  { %v2298_v41 = vmul.f32 0.6931472, %v2914_v15 }
0x288d   :  { %v2299_v17 = vsub.f32 %v2292_v10, %v2298_v41 }
0x288f   :  { %2300 = vst [vmem:[#allocation9] sm:$0xff] %v2299_v17 }
0x2890   :  { %2974 = shalt.err (!%p2971_p0)
}
0x2891   :  { %2310 = dma.vmem_to_hbm [thread:$0]  %s2308_s16, 128, %s3582_s3, [#allocation4]  }
0x2892   :  { %2989 = dma.done.wait [#allocation4], 128  }
0x2893   :  { %2990 = vsyncadd [#allocation4], 4294967168 }
0x2894   :  { %2314 = vsyncpa [#allocation3], 1 }
0x2895   :  { %2315 = vsyncpa [#allocation8], 1 }
0x2896   :  { %2316 = vsyncpa [#allocation4], 1 }
0x2897   :  { %2317 = vsyncpa [#allocation5], 1 }

</bundles_post_ra>
